<compile_context>
chip_gen: v6e
topology: v6e:2x2x1
jax: 0.10.0
libtpu: 0.0.40
codegen_flags: <defaults>
</compile_context>

<pallas_src>
import functools

import jax
import jax.numpy as jnp
from jax import lax
from jax.experimental import pallas as pl
from jax.experimental.pallas import tpu as pltpu


def _round_up(x, m):
    return (x + m - 1) // m * m


# ---------------------------------------------------------------------------
# Fused kernel: one grid step = (one batch item, TH output rows)
#   1) expand 1x1 conv + BN + ReLU6 over the halo'd input-row window
#   2) depthwise 3x3 (stride 1 or 2, BN scale pre-folded into weights)
#      + bias + ReLU6
#   3) project 1x1 conv + BN (+ residual add)
# ---------------------------------------------------------------------------
def _fused_kernel(*refs, stride, TH, HIN, H, W, W_out, has_expand, use_res):
    if has_expand:
        (x_ref, w1_ref, s1_ref, b1_ref,
         wd_ref, bd_ref,
         w3_ref, s3_ref, b3_ref,
         o_ref, h_scr) = refs
    else:
        (x_ref,
         wd_ref, bd_ref,
         w3_ref, s3_ref, b3_ref,
         o_ref, h_scr) = refs

    Wp = x_ref.shape[2]          # spatially padded, sublane-aligned width
    Cin_p = x_ref.shape[3]       # lane-padded input channels
    Hid_p = h_scr.shape[2]       # lane-padded hidden channels
    Cout_p = o_ref.shape[3]      # lane-padded output channels

    j = pl.program_id(1)
    # first padded-input row of this block's halo'd window
    base = pl.multiple_of(j * (TH * stride), TH * stride)

    # ---- 1) expansion pointwise conv + BN + ReLU6 (skipped if t == 1) ------
    xw = x_ref[0, pl.ds(base, HIN), :, :]                 # (HIN, Wp, Cin_p)
    if has_expand:
        xm = xw.reshape(HIN * Wp, Cin_p).astype(jnp.bfloat16)
        y = jnp.dot(xm, w1_ref[...], preferred_element_type=jnp.float32)
        y = jnp.clip(y * s1_ref[...] + b1_ref[...], 0.0, 6.0)
        hw = y.reshape(HIN, Wp, Hid_p)
        # 3x3-conv halo: the spatial padding must be zeros of the *hidden*
        # tensor (not BN(0)), so mask the pad rows/cols of the window here
        # (no HBM pad of the hidden tensor exists anywhere).
        row = lax.broadcasted_iota(jnp.int32, (HIN, Wp, 1), 0) + base
        col = lax.broadcasted_iota(jnp.int32, (HIN, Wp, 1), 1)
        halo = (row == 0) | (row >= H + 1) | (col == 0) | (col >= W + 1)
        h_scr[...] = jnp.where(halo, 0.0, hw)
    else:
        # no expansion: the zero-padded input IS the hidden tensor, and its
        # halo / alignment padding is already exact zeros -> no mask needed.
        h_scr[...] = xw.astype(jnp.float32)

    # ---- 2) depthwise 3x3 conv (BN scale folded into wd) + bias + ReLU6 ----
    acc = jnp.zeros((TH, W_out, Hid_p), jnp.float32)
    wd = wd_ref[...]                                      # (3, 3, Hid_p)
    for kh in range(3):
        for kw in range(3):
            if stride == 1:
                tap = h_scr[kh:kh + TH, kw:kw + W_out, :]
            else:
                # TODO(synk): stride-2 taps use strided loads; an even/odd
                # space-to-depth pre-split would avoid the 9 relayouts.
                tap = h_scr[pl.ds(kh, TH, stride=stride),
                            pl.ds(kw, W_out, stride=stride), :]
            acc = acc + tap * wd[kh, kw, :]
    d = jnp.clip(acc + bd_ref[...], 0.0, 6.0)

    # ---- 3) projection pointwise conv + BN (+ residual) --------------------
    dm = d.reshape(TH * W_out, Hid_p).astype(jnp.bfloat16)
    o = jnp.dot(dm, w3_ref[...], preferred_element_type=jnp.float32)
    o = o * s3_ref[...] + b3_ref[...]
    if use_res:
        # residual rows/cols of the (already resident) padded input block
        res = x_ref[0, pl.ds(base + 1, TH), pl.ds(1, W_out), :]
        o = o + res.reshape(TH * W_out, Cout_p).astype(jnp.float32)
    o_ref[...] = o.reshape(1, TH, W_out, Cout_p).astype(o_ref.dtype)


# ---------------------------------------------------------------------------
# Row-tile picker: largest divisor of H_out whose per-block scratch fits a
# small VMEM budget (safe on v7x's 64 MiB), preferring >= 2 row blocks so both
# v7x TensorCores get work and the grid never degenerates to a single step.
# ---------------------------------------------------------------------------
def _pick_tile_h(H_out, W_out, Wp, Hid_p, stride, budget_bytes=2 << 20):
    def vmem(th):
        hin = (th - 1) * stride + 3
        return 4 * (hin * Wp * Hid_p + 2 * th * W_out * Hid_p)
    divs = [d for d in range(1, H_out + 1) if H_out % d == 0]
    fitting = [d for d in divs if vmem(d) <= budget_bytes] or [1]
    multi = [d for d in fitting if H_out // d >= 2]
    return max(multi) if multi else max(fitting)


# ---------------------------------------------------------------------------
# InvertedResidual forward (NCHW in / NCHW out, like the PyTorch module)
# ---------------------------------------------------------------------------
def inverted_residual(x_nchw, params, *, inp, oup, stride, expand_ratio):
    assert stride in (1, 2)
    N, Cin, H, W = x_nchw.shape
    assert Cin == inp
    hidden = int(inp * expand_ratio)
    has_expand = expand_ratio != 1
    use_res = (stride == 1) and (inp == oup)

    H_out = (H + 2 - 3) // stride + 1
    W_out = (W + 2 - 3) // stride + 1

    Cin_p = _round_up(inp, 128)
    Hid_p = _round_up(hidden, 128)
    Cout_p = _round_up(oup, 128)
    Wp = _round_up(W + 2, 8)          # sublane-aligned padded width

    # NHWC + ONE combined pad: 1-row/col conv halo, width alignment, lane pad
    # (only the small un-expanded input is padded; the hidden tensor never is).
    x = jnp.transpose(x_nchw, (0, 2, 3, 1))
    xpad = jnp.pad(x, ((0, 0), (1, 1), (1, Wp - (W + 1)), (0, Cin_p - inp)))

    def pad_to(a, shape):
        return jnp.pad(a, [(0, s - d) for s, d in zip(shape, a.shape)])

    # fold the depthwise BN scale into the 3x3 weights (host-side, f32 exact
    # up to rounding) so the kernel epilogue is just add+clip.
    wd_folded = params['wd'] * params['sd'].reshape(1, 1, -1)

    args = [xpad]
    in_specs = [pl.BlockSpec((1, H + 2, Wp, Cin_p), lambda n, j: (n, 0, 0, 0))]
    if has_expand:
        args += [pad_to(params['w1'], (Cin_p, Hid_p)).astype(jnp.bfloat16),
                 pad_to(params['s1'], (1, Hid_p)),
                 pad_to(params['b1'], (1, Hid_p))]
        in_specs += [pl.BlockSpec((Cin_p, Hid_p), lambda n, j: (0, 0)),
                     pl.BlockSpec((1, Hid_p), lambda n, j: (0, 0)),
                     pl.BlockSpec((1, Hid_p), lambda n, j: (0, 0))]
    args += [pad_to(wd_folded, (3, 3, Hid_p)),
             pad_to(params['bd'], (1, Hid_p)),
             pad_to(params['w3'], (Hid_p, Cout_p)).astype(jnp.bfloat16),
             pad_to(params['s3'], (1, Cout_p)),
             pad_to(params['b3'], (1, Cout_p))]
    in_specs += [pl.BlockSpec((3, 3, Hid_p), lambda n, j: (0, 0, 0)),
                 pl.BlockSpec((1, Hid_p), lambda n, j: (0, 0)),
                 pl.BlockSpec((Hid_p, Cout_p), lambda n, j: (0, 0)),
                 pl.BlockSpec((1, Cout_p), lambda n, j: (0, 0)),
                 pl.BlockSpec((1, Cout_p), lambda n, j: (0, 0))]

    TH = _pick_tile_h(H_out, W_out, Wp, Hid_p, stride)
    HB = H_out // TH
    HIN = (TH - 1) * stride + 3        # input rows needed per block (w/ halo)

    kernel = functools.partial(
        _fused_kernel, stride=stride, TH=TH, HIN=HIN, H=H, W=W, W_out=W_out,
        has_expand=has_expand, use_res=use_res)

    out = pl.pallas_call(
        kernel,
        out_shape=jax.ShapeDtypeStruct((N, H_out, W_out, Cout_p), x.dtype),
        grid=(N, HB),
        in_specs=in_specs,
        out_specs=pl.BlockSpec((1, TH, W_out, Cout_p),
                               lambda n, j: (n, j, 0, 0)),
        scratch_shapes=[pltpu.VMEM((HIN, Wp, Hid_p), jnp.float32)],
        compiler_params=pltpu.CompilerParams(
            dimension_semantics=("parallel", "parallel"),
            vmem_limit_bytes=32 * 1024 * 1024),
    )(*args)

    # drop channel padding, back to NCHW
    return jnp.transpose(out[:, :, :, :oup], (0, 3, 1, 2))


# ---------------------------------------------------------------------------
# Deterministic parameter construction (synthetic; BN folded to scale/bias)
# ---------------------------------------------------------------------------
def _fold_bn(key, c, eps=1e-5):
    k1, k2, k3, k4 = jax.random.split(key, 4)
    gamma = 1.0 + 0.1 * jax.random.normal(k1, (c,), jnp.float32)
    beta = 0.1 * jax.random.normal(k2, (c,), jnp.float32)
    mean = 0.1 * jax.random.normal(k3, (c,), jnp.float32)
    var = 0.9 + 0.2 * jax.random.uniform(k4, (c,), jnp.float32)
    scale = gamma / jnp.sqrt(var + eps)
    bias = beta - mean * scale
    return scale.reshape(1, c), bias.reshape(1, c)


def make_params(key, inp, oup, expand_ratio):
    hidden = int(inp * expand_ratio)
    keys = jax.random.split(key, 6)
    p = {}
    if expand_ratio != 1:
        p['w1'] = 0.2 * jax.random.normal(keys[0], (inp, hidden), jnp.float32)
        p['s1'], p['b1'] = _fold_bn(keys[1], hidden)
    p['wd'] = 0.2 * jax.random.normal(keys[2], (3, 3, hidden), jnp.float32)
    p['sd'], p['bd'] = _fold_bn(keys[3], hidden)
    p['w3'] = 0.2 * jax.random.normal(keys[4], (hidden, oup), jnp.float32)
    p['s3'], p['b3'] = _fold_bn(keys[5], oup)
    return p


# ---------------------------------------------------------------------------
# Pure-JAX reference (mirrors the kernel's bf16 matmul inputs / f32 accumulate
# so the check can use a tight tolerance)
# ---------------------------------------------------------------------------
def reference(x_nchw, p, *, inp, oup, stride, expand_ratio):
    use_res = (stride == 1) and (inp == oup)
    x = jnp.transpose(x_nchw, (0, 2, 3, 1)).astype(jnp.float32)
    h = x
    if expand_ratio != 1:
        h = jnp.einsum('nhwc,cd->nhwd',
                       x.astype(jnp.bfloat16), p['w1'].astype(jnp.bfloat16),
                       preferred_element_type=jnp.float32)
        h = jnp.clip(h * p['s1'] + p['b1'], 0.0, 6.0)
    dw = lax.conv_general_dilated(
        h, p['wd'][:, :, None, :], window_strides=(stride, stride),
        padding=((1, 1), (1, 1)),
        dimension_numbers=('NHWC', 'HWIO', 'NHWC'),
        feature_group_count=h.shape[-1],
        precision=lax.Precision.HIGHEST)
    dw = jnp.clip(dw * p['sd'] + p['bd'], 0.0, 6.0)
    out = jnp.einsum('nhwc,cd->nhwd',
                     dw.astype(jnp.bfloat16), p['w3'].astype(jnp.bfloat16),
                     preferred_element_type=jnp.float32)
    out = out * p['s3'] + p['b3']
    if use_res:
        out = out + x
    return jnp.transpose(out, (0, 3, 1, 2))


# ---------------------------------------------------------------------------
if __name__ == "__main__":
    inp, oup, stride, expand_ratio = 4, 4, 1, 6   # use_res_connect = True
    N, H, W = 2, 16, 16

    key = jax.random.PRNGKey(0)
    kx, kp = jax.random.split(key)
    x = jax.random.normal(kx, (N, inp, H, W), jnp.float32)
    params = make_params(kp, inp, oup, expand_ratio)

    out = jax.block_until_ready(
        inverted_residual(x, params, inp=inp, oup=oup,
                          stride=stride, expand_ratio=expand_ratio))
    ref = jax.block_until_ready(
        reference(x, params, inp=inp, oup=oup,
                  stride=stride, expand_ratio=expand_ratio))

    assert out.shape == (N, oup, H, W), out.shape
    err = float(jnp.max(jnp.abs(out - ref)))
    assert err < 5e-3, f"max abs err {err}"
    print("KERNEL_OK")
</pallas_src>

<mosaic_0001>
module attributes {stable_mosaic.version = 11 : i64} {
  func.func @_fused_kernel(%arg0: i32, %arg1: i32, %arg2: memref<1x18x24x128xf32, #tpu.memory_space<vmem>>, %arg3: memref<128x128xbf16, #tpu.memory_space<vmem>>, %arg4: memref<1x128xf32, #tpu.memory_space<vmem>>, %arg5: memref<1x128xf32, #tpu.memory_space<vmem>>, %arg6: memref<3x3x128xf32, #tpu.memory_space<vmem>>, %arg7: memref<1x128xf32, #tpu.memory_space<vmem>>, %arg8: memref<128x128xbf16, #tpu.memory_space<vmem>>, %arg9: memref<1x128xf32, #tpu.memory_space<vmem>>, %arg10: memref<1x128xf32, #tpu.memory_space<vmem>>, %arg11: memref<1x8x16x128xf32, #tpu.memory_space<vmem>>, %arg12: memref<10x24x128xf32, #tpu.memory_space<vmem>>) attributes {dimension_semantics = [#tpu.dimension_semantics<parallel>, #tpu.dimension_semantics<parallel>], iteration_bounds = array<i64: 2, 2>, scalar_prefetch = 0 : i64, scratch_operands = 1 : i64, tpu.core_type = #tpu.core_type<tc>, window_params = [{transform_indices = @transform_0, window_bounds = array<i64: 1, 18, 24, 128>}, {pipeline_mode = #tpu.pipeline_mode<synchronous>, transform_indices = @transform_1, window_bounds = array<i64: 128, 128>}, {pipeline_mode = #tpu.pipeline_mode<synchronous>, transform_indices = @transform_2, window_bounds = array<i64: 1, 128>}, {pipeline_mode = #tpu.pipeline_mode<synchronous>, transform_indices = @transform_3, window_bounds = array<i64: 1, 128>}, {pipeline_mode = #tpu.pipeline_mode<synchronous>, transform_indices = @transform_4, window_bounds = array<i64: 3, 3, 128>}, {pipeline_mode = #tpu.pipeline_mode<synchronous>, transform_indices = @transform_5, window_bounds = array<i64: 1, 128>}, {pipeline_mode = #tpu.pipeline_mode<synchronous>, transform_indices = @transform_6, window_bounds = array<i64: 128, 128>}, {pipeline_mode = #tpu.pipeline_mode<synchronous>, transform_indices = @transform_7, window_bounds = array<i64: 1, 128>}, {pipeline_mode = #tpu.pipeline_mode<synchronous>, transform_indices = @transform_8, window_bounds = array<i64: 1, 128>}, {transform_indices = @transform_9, window_bounds = array<i64: 1, 8, 16, 128>}]} {
    %c8_i32 = arith.constant 8 : i32
    %0 = arith.muli %arg1, %c8_i32 : i32
    %1 = tpu.assume_multiple %0, 8 : i32
    %c0 = arith.constant 0 : index
    %2 = arith.index_cast %1 : i32 to index
    %c0_0 = arith.constant 0 : index
    %c0_1 = arith.constant 0 : index
    %3 = vector.load %arg2[%c0, %2, %c0_0, %c0_1] : memref<1x18x24x128xf32, #tpu.memory_space<vmem>>, vector<1x10x24x128xf32>
    %4 = vector.shape_cast %3 : vector<1x10x24x128xf32> to vector<10x24x128xf32>
    %5 = vector.shape_cast %4 : vector<10x24x128xf32> to vector<240x128xf32>
    %6 = arith.truncf %5 : vector<240x128xf32> to vector<240x128xbf16>
    %c0_2 = arith.constant 0 : index
    %c0_3 = arith.constant 0 : index
    %7 = vector.load %arg3[%c0_2, %c0_3] : memref<128x128xbf16, #tpu.memory_space<vmem>>, vector<128x128xbf16>
    %cst = arith.constant dense<0.000000e+00> : vector<240x128xf32>
    %8 = tpu.matmul %6, %7, %cst {dimension_numbers = #tpu.dot_dimension_numbers<[1], [0], [0], [1], [0, 0, 1, 1], [], []>} : vector<240x128xbf16>, vector<128x128xbf16>, vector<240x128xf32> -> vector<240x128xf32>
    %c0_4 = arith.constant 0 : index
    %c0_5 = arith.constant 0 : index
    %9 = vector.load %arg4[%c0_4, %c0_5] : memref<1x128xf32, #tpu.memory_space<vmem>>, vector<1x128xf32>
    %10 = vector.broadcast %9 : vector<1x128xf32> to vector<240x128xf32>
    %11 = arith.mulf %8, %10 : vector<240x128xf32>
    %c0_6 = arith.constant 0 : index
    %c0_7 = arith.constant 0 : index
    %12 = vector.load %arg5[%c0_6, %c0_7] : memref<1x128xf32, #tpu.memory_space<vmem>>, vector<1x128xf32>
    %13 = vector.broadcast %12 : vector<1x128xf32> to vector<240x128xf32>
    %14 = arith.addf %11, %13 : vector<240x128xf32>
    %cst_8 = arith.constant 0.000000e+00 : f32
    %cst_9 = arith.constant 6.000000e+00 : f32
    %15 = vector.broadcast %cst_8 : f32 to vector<240x128xf32>
    %16 = arith.maximumf %15, %14 : vector<240x128xf32>
    %17 = vector.broadcast %cst_9 : f32 to vector<240x128xf32>
    %18 = arith.minimumf %17, %16 : vector<240x128xf32>
    %19 = vector.shape_cast %18 : vector<240x128xf32> to vector<10x24x128xf32>
    %20 = tpu.iota {dimensions = array<i32: 0>} : vector<10x24x1xi32>
    %21 = vector.broadcast %1 : i32 to vector<10x24x1xi32>
    %22 = arith.addi %20, %21 : vector<10x24x1xi32>
    %23 = tpu.iota {dimensions = array<i32: 1>} : vector<10x24x1xi32>
    %c0_i32 = arith.constant 0 : i32
    %24 = vector.broadcast %c0_i32 : i32 to vector<10x24x1xi32>
    %25 = arith.cmpi eq, %22, %24 : vector<10x24x1xi32>
    %c17_i32 = arith.constant 17 : i32
    %26 = vector.broadcast %c17_i32 : i32 to vector<10x24x1xi32>
    %27 = arith.cmpi sge, %22, %26 : vector<10x24x1xi32>
    %28 = arith.ori %25, %27 : vector<10x24x1xi1>
    %c0_i32_10 = arith.constant 0 : i32
    %29 = vector.broadcast %c0_i32_10 : i32 to vector<10x24x1xi32>
    %30 = arith.cmpi eq, %23, %29 : vector<10x24x1xi32>
    %31 = arith.ori %28, %30 : vector<10x24x1xi1>
    %c17_i32_11 = arith.constant 17 : i32
    %32 = vector.broadcast %c17_i32_11 : i32 to vector<10x24x1xi32>
    %33 = arith.cmpi sge, %23, %32 : vector<10x24x1xi32>
    %34 = arith.ori %31, %33 : vector<10x24x1xi1>
    %cst_12 = arith.constant 0.000000e+00 : f32
    %35 = vector.shape_cast %34 : vector<10x24x1xi1> to vector<10x24x1xi1>
    %36 = vector.broadcast %35 : vector<10x24x1xi1> to vector<10x24x128xi1>
    %37 = vector.broadcast %cst_12 : f32 to vector<10x24x128xf32>
    %38 = arith.select %36, %37, %19 : vector<10x24x128xi1>, vector<10x24x128xf32>
    %c0_13 = arith.constant 0 : index
    %c0_14 = arith.constant 0 : index
    %c0_15 = arith.constant 0 : index
    %39 = vector.load %arg12[%c0_13, %c0_14, %c0_15] : memref<10x24x128xf32, #tpu.memory_space<vmem>>, vector<10x24x128xf32>
    tpu.vector_store %arg12[%c0_13, %c0_14, %c0_15], %38 {strides = array<i32>} : memref<10x24x128xf32, #tpu.memory_space<vmem>>, vector<10x24x128xf32>,
    %cst_16 = arith.constant 0.000000e+00 : f32
    %40 = vector.broadcast %cst_16 : f32 to vector<8x16x128xf32>
    %c0_17 = arith.constant 0 : index
    %c0_18 = arith.constant 0 : index
    %c0_19 = arith.constant 0 : index
    %41 = vector.load %arg6[%c0_17, %c0_18, %c0_19] : memref<3x3x128xf32, #tpu.memory_space<vmem>>, vector<3x3x128xf32>
    %c0_20 = arith.constant 0 : index
    %c0_21 = arith.constant 0 : index
    %c0_22 = arith.constant 0 : index
    %42 = vector.load %arg12[%c0_20, %c0_21, %c0_22] : memref<10x24x128xf32, #tpu.memory_space<vmem>>, vector<8x16x128xf32>
    %43 = vector.extract_strided_slice %41 {offsets = [0, 0, 0], sizes = [1, 1, 128], strides = [1, 1, 1]} : vector<3x3x128xf32> to vector<1x1x128xf32>
    %44 = vector.shape_cast %43 : vector<1x1x128xf32> to vector<128xf32>
    %45 = vector.shape_cast %44 : vector<128xf32> to vector<1x1x128xf32>
    %46 = vector.broadcast %45 : vector<1x1x128xf32> to vector<8x16x128xf32>
    %47 = arith.mulf %42, %46 : vector<8x16x128xf32>
    %48 = arith.addf %40, %47 : vector<8x16x128xf32>
    %c0_23 = arith.constant 0 : index
    %c1 = arith.constant 1 : index
    %c0_24 = arith.constant 0 : index
    %49 = vector.load %arg12[%c0_23, %c1, %c0_24] : memref<10x24x128xf32, #tpu.memory_space<vmem>>, vector<8x16x128xf32>
    %50 = vector.extract_strided_slice %41 {offsets = [0, 1, 0], sizes = [1, 1, 128], strides = [1, 1, 1]} : vector<3x3x128xf32> to vector<1x1x128xf32>
    %51 = vector.shape_cast %50 : vector<1x1x128xf32> to vector<128xf32>
    %52 = vector.shape_cast %51 : vector<128xf32> to vector<1x1x128xf32>
    %53 = vector.broadcast %52 : vector<1x1x128xf32> to vector<8x16x128xf32>
    %54 = arith.mulf %49, %53 : vector<8x16x128xf32>
    %55 = arith.addf %48, %54 : vector<8x16x128xf32>
    %c0_25 = arith.constant 0 : index
    %c2 = arith.constant 2 : index
    %c0_26 = arith.constant 0 : index
    %56 = vector.load %arg12[%c0_25, %c2, %c0_26] : memref<10x24x128xf32, #tpu.memory_space<vmem>>, vector<8x16x128xf32>
    %57 = vector.extract_strided_slice %41 {offsets = [0, 2, 0], sizes = [1, 1, 128], strides = [1, 1, 1]} : vector<3x3x128xf32> to vector<1x1x128xf32>
    %58 = vector.shape_cast %57 : vector<1x1x128xf32> to vector<128xf32>
    %59 = vector.shape_cast %58 : vector<128xf32> to vector<1x1x128xf32>
    %60 = vector.broadcast %59 : vector<1x1x128xf32> to vector<8x16x128xf32>
    %61 = arith.mulf %56, %60 : vector<8x16x128xf32>
    %62 = arith.addf %55, %61 : vector<8x16x128xf32>
    %c1_27 = arith.constant 1 : index
    %c0_28 = arith.constant 0 : index
    %c0_29 = arith.constant 0 : index
    %63 = vector.load %arg12[%c1_27, %c0_28, %c0_29] : memref<10x24x128xf32, #tpu.memory_space<vmem>>, vector<8x16x128xf32>
    %64 = vector.extract_strided_slice %41 {offsets = [1, 0, 0], sizes = [1, 1, 128], strides = [1, 1, 1]} : vector<3x3x128xf32> to vector<1x1x128xf32>
    %65 = vector.shape_cast %64 : vector<1x1x128xf32> to vector<128xf32>
    %66 = vector.shape_cast %65 : vector<128xf32> to vector<1x1x128xf32>
    %67 = vector.broadcast %66 : vector<1x1x128xf32> to vector<8x16x128xf32>
    %68 = arith.mulf %63, %67 : vector<8x16x128xf32>
    %69 = arith.addf %62, %68 : vector<8x16x128xf32>
    %c1_30 = arith.constant 1 : index
    %c1_31 = arith.constant 1 : index
    %c0_32 = arith.constant 0 : index
    %70 = vector.load %arg12[%c1_30, %c1_31, %c0_32] : memref<10x24x128xf32, #tpu.memory_space<vmem>>, vector<8x16x128xf32>
    %71 = vector.extract_strided_slice %41 {offsets = [1, 1, 0], sizes = [1, 1, 128], strides = [1, 1, 1]} : vector<3x3x128xf32> to vector<1x1x128xf32>
    %72 = vector.shape_cast %71 : vector<1x1x128xf32> to vector<128xf32>
    %73 = vector.shape_cast %72 : vector<128xf32> to vector<1x1x128xf32>
    %74 = vector.broadcast %73 : vector<1x1x128xf32> to vector<8x16x128xf32>
    %75 = arith.mulf %70, %74 : vector<8x16x128xf32>
    %76 = arith.addf %69, %75 : vector<8x16x128xf32>
    %c1_33 = arith.constant 1 : index
    %c2_34 = arith.constant 2 : index
    %c0_35 = arith.constant 0 : index
    %77 = vector.load %arg12[%c1_33, %c2_34, %c0_35] : memref<10x24x128xf32, #tpu.memory_space<vmem>>, vector<8x16x128xf32>
    %78 = vector.extract_strided_slice %41 {offsets = [1, 2, 0], sizes = [1, 1, 128], strides = [1, 1, 1]} : vector<3x3x128xf32> to vector<1x1x128xf32>
    %79 = vector.shape_cast %78 : vector<1x1x128xf32> to vector<128xf32>
    %80 = vector.shape_cast %79 : vector<128xf32> to vector<1x1x128xf32>
    %81 = vector.broadcast %80 : vector<1x1x128xf32> to vector<8x16x128xf32>
    %82 = arith.mulf %77, %81 : vector<8x16x128xf32>
    %83 = arith.addf %76, %82 : vector<8x16x128xf32>
    %c2_36 = arith.constant 2 : index
    %c0_37 = arith.constant 0 : index
    %c0_38 = arith.constant 0 : index
    %84 = vector.load %arg12[%c2_36, %c0_37, %c0_38] : memref<10x24x128xf32, #tpu.memory_space<vmem>>, vector<8x16x128xf32>
    %85 = vector.extract_strided_slice %41 {offsets = [2, 0, 0], sizes = [1, 1, 128], strides = [1, 1, 1]} : vector<3x3x128xf32> to vector<1x1x128xf32>
    %86 = vector.shape_cast %85 : vector<1x1x128xf32> to vector<128xf32>
    %87 = vector.shape_cast %86 : vector<128xf32> to vector<1x1x128xf32>
    %88 = vector.broadcast %87 : vector<1x1x128xf32> to vector<8x16x128xf32>
    %89 = arith.mulf %84, %88 : vector<8x16x128xf32>
    %90 = arith.addf %83, %89 : vector<8x16x128xf32>
    %c2_39 = arith.constant 2 : index
    %c1_40 = arith.constant 1 : index
    %c0_41 = arith.constant 0 : index
    %91 = vector.load %arg12[%c2_39, %c1_40, %c0_41] : memref<10x24x128xf32, #tpu.memory_space<vmem>>, vector<8x16x128xf32>
    %92 = vector.extract_strided_slice %41 {offsets = [2, 1, 0], sizes = [1, 1, 128], strides = [1, 1, 1]} : vector<3x3x128xf32> to vector<1x1x128xf32>
    %93 = vector.shape_cast %92 : vector<1x1x128xf32> to vector<128xf32>
    %94 = vector.shape_cast %93 : vector<128xf32> to vector<1x1x128xf32>
    %95 = vector.broadcast %94 : vector<1x1x128xf32> to vector<8x16x128xf32>
    %96 = arith.mulf %91, %95 : vector<8x16x128xf32>
    %97 = arith.addf %90, %96 : vector<8x16x128xf32>
    %c2_42 = arith.constant 2 : index
    %c2_43 = arith.constant 2 : index
    %c0_44 = arith.constant 0 : index
    %98 = vector.load %arg12[%c2_42, %c2_43, %c0_44] : memref<10x24x128xf32, #tpu.memory_space<vmem>>, vector<8x16x128xf32>
    %99 = vector.extract_strided_slice %41 {offsets = [2, 2, 0], sizes = [1, 1, 128], strides = [1, 1, 1]} : vector<3x3x128xf32> to vector<1x1x128xf32>
    %100 = vector.shape_cast %99 : vector<1x1x128xf32> to vector<128xf32>
    %101 = vector.shape_cast %100 : vector<128xf32> to vector<1x1x128xf32>
    %102 = vector.broadcast %101 : vector<1x1x128xf32> to vector<8x16x128xf32>
    %103 = arith.mulf %98, %102 : vector<8x16x128xf32>
    %104 = arith.addf %97, %103 : vector<8x16x128xf32>
    %c0_45 = arith.constant 0 : index
    %c0_46 = arith.constant 0 : index
    %105 = vector.load %arg7[%c0_45, %c0_46] : memref<1x128xf32, #tpu.memory_space<vmem>>, vector<1x128xf32>
    %106 = vector.shape_cast %105 : vector<1x128xf32> to vector<1x1x128xf32>
    %107 = vector.broadcast %106 : vector<1x1x128xf32> to vector<8x16x128xf32>
    %108 = arith.addf %104, %107 : vector<8x16x128xf32>
    %cst_47 = arith.constant 0.000000e+00 : f32
    %cst_48 = arith.constant 6.000000e+00 : f32
    %109 = vector.broadcast %cst_47 : f32 to vector<8x16x128xf32>
    %110 = arith.maximumf %109, %108 : vector<8x16x128xf32>
    %111 = vector.broadcast %cst_48 : f32 to vector<8x16x128xf32>
    %112 = arith.minimumf %111, %110 : vector<8x16x128xf32>
    %113 = vector.shape_cast %112 : vector<8x16x128xf32> to vector<128x128xf32>
    %114 = arith.truncf %113 : vector<128x128xf32> to vector<128x128xbf16>
    %c0_49 = arith.constant 0 : index
    %c0_50 = arith.constant 0 : index
    %115 = vector.load %arg8[%c0_49, %c0_50] : memref<128x128xbf16, #tpu.memory_space<vmem>>, vector<128x128xbf16>
    %cst_51 = arith.constant dense<0.000000e+00> : vector<128x128xf32>
    %116 = tpu.matmul %114, %115, %cst_51 {dimension_numbers = #tpu.dot_dimension_numbers<[1], [0], [0], [1], [0, 0, 1, 1], [], []>} : vector<128x128xbf16>, vector<128x128xbf16>, vector<128x128xf32> -> vector<128x128xf32>
    %c0_52 = arith.constant 0 : index
    %c0_53 = arith.constant 0 : index
    %117 = vector.load %arg9[%c0_52, %c0_53] : memref<1x128xf32, #tpu.memory_space<vmem>>, vector<1x128xf32>
    %118 = vector.broadcast %117 : vector<1x128xf32> to vector<128x128xf32>
    %119 = arith.mulf %116, %118 : vector<128x128xf32>
    %c0_54 = arith.constant 0 : index
    %c0_55 = arith.constant 0 : index
    %120 = vector.load %arg10[%c0_54, %c0_55] : memref<1x128xf32, #tpu.memory_space<vmem>>, vector<1x128xf32>
    %121 = vector.broadcast %120 : vector<1x128xf32> to vector<128x128xf32>
    %122 = arith.addf %119, %121 : vector<128x128xf32>
    %c1_i32 = arith.constant 1 : i32
    %123 = arith.addi %1, %c1_i32 : i32
    %c0_56 = arith.constant 0 : index
    %124 = arith.index_cast %123 : i32 to index
    %c1_57 = arith.constant 1 : index
    %c0_58 = arith.constant 0 : index
    %125 = vector.load %arg2[%c0_56, %124, %c1_57, %c0_58] : memref<1x18x24x128xf32, #tpu.memory_space<vmem>>, vector<1x8x16x128xf32>
    %126 = vector.shape_cast %125 : vector<1x8x16x128xf32> to vector<8x16x128xf32>
    %127 = vector.shape_cast %126 : vector<8x16x128xf32> to vector<128x128xf32>
    %128 = arith.addf %122, %127 : vector<128x128xf32>
    %129 = vector.shape_cast %128 : vector<128x128xf32> to vector<1x8x16x128xf32>
    %c0_59 = arith.constant 0 : index
    %c0_60 = arith.constant 0 : index
    %c0_61 = arith.constant 0 : index
    %c0_62 = arith.constant 0 : index
    %130 = vector.load %arg11[%c0_59, %c0_60, %c0_61, %c0_62] : memref<1x8x16x128xf32, #tpu.memory_space<vmem>>, vector<1x8x16x128xf32>
    tpu.vector_store %arg11[%c0_59, %c0_60, %c0_61, %c0_62], %129 {strides = array<i32>} : memref<1x8x16x128xf32, #tpu.memory_space<vmem>>, vector<1x8x16x128xf32>,
    return
  }
  func.func @transform_0(%arg0: i32, %arg1: i32) -> (i32, i32, i32, i32) {
    %c0_i32 = arith.constant 0 : i32
    %c0_i32_0 = arith.constant 0 : i32
    %c0_i32_1 = arith.constant 0 : i32
    %c0_i32_2 = arith.constant 0 : i32
    return %arg0, %c0_i32, %c0_i32_0, %c0_i32_1 : i32, i32, i32, i32
  }
  func.func @transform_1(%arg0: i32, %arg1: i32) -> (i32, i32) {
    %c0_i32 = arith.constant 0 : i32
    %c0_i32_0 = arith.constant 0 : i32
    %c0_i32_1 = arith.constant 0 : i32
    return %c0_i32, %c0_i32_0 : i32, i32
  }
  func.func @transform_2(%arg0: i32, %arg1: i32) -> (i32, i32) {
    %c0_i32 = arith.constant 0 : i32
    %c0_i32_0 = arith.constant 0 : i32
    %c0_i32_1 = arith.constant 0 : i32
    return %c0_i32, %c0_i32_0 : i32, i32
  }
  func.func @transform_3(%arg0: i32, %arg1: i32) -> (i32, i32) {
    %c0_i32 = arith.constant 0 : i32
    %c0_i32_0 = arith.constant 0 : i32
    %c0_i32_1 = arith.constant 0 : i32
    return %c0_i32, %c0_i32_0 : i32, i32
  }
  func.func @transform_4(%arg0: i32, %arg1: i32) -> (i32, i32, i32) {
    %c0_i32 = arith.constant 0 : i32
    %c0_i32_0 = arith.constant 0 : i32
    %c0_i32_1 = arith.constant 0 : i32
    %c0_i32_2 = arith.constant 0 : i32
    return %c0_i32, %c0_i32_0, %c0_i32_1 : i32, i32, i32
  }
  func.func @transform_5(%arg0: i32, %arg1: i32) -> (i32, i32) {
    %c0_i32 = arith.constant 0 : i32
    %c0_i32_0 = arith.constant 0 : i32
    %c0_i32_1 = arith.constant 0 : i32
    return %c0_i32, %c0_i32_0 : i32, i32
  }
  func.func @transform_6(%arg0: i32, %arg1: i32) -> (i32, i32) {
    %c0_i32 = arith.constant 0 : i32
    %c0_i32_0 = arith.constant 0 : i32
    %c0_i32_1 = arith.constant 0 : i32
    return %c0_i32, %c0_i32_0 : i32, i32
  }
  func.func @transform_7(%arg0: i32, %arg1: i32) -> (i32, i32) {
    %c0_i32 = arith.constant 0 : i32
    %c0_i32_0 = arith.constant 0 : i32
    %c0_i32_1 = arith.constant 0 : i32
    return %c0_i32, %c0_i32_0 : i32, i32
  }
  func.func @transform_8(%arg0: i32, %arg1: i32) -> (i32, i32) {
    %c0_i32 = arith.constant 0 : i32
    %c0_i32_0 = arith.constant 0 : i32
    %c0_i32_1 = arith.constant 0 : i32
    return %c0_i32, %c0_i32_0 : i32, i32
  }
  func.func @transform_9(%arg0: i32, %arg1: i32) -> (i32, i32, i32, i32) {
    %c0_i32 = arith.constant 0 : i32
    %c0_i32_0 = arith.constant 0 : i32
    %c0_i32_1 = arith.constant 0 : i32
    return %arg0, %arg1, %c0_i32, %c0_i32_0 : i32, i32, i32, i32
  }
}

</mosaic_0001>

<bundles_post_ra>
// kernel: tpu_custom_call.1
= control target key start
LH: loop header
LB: loop body
LE: loop exit
PB: predicated region body
PF: predicated region fallthrough
CT: control target
= control target key end

     0   :  { %s3798_s0 = inlined_call_operand.hbm [shape: f32[2,18,24,128], index: 0, kind: input, shape index: {}]   ;;  %s3799_s1 = inlined_call_operand.hbm [shape: bf16[128,128], index: 1, kind: input, shape index: {}]   ;;  %s3800_s2 = inlined_call_operand.vmem [shape: f32[1,128], index: 2, kind: input, shape index: {}]   ;;  %s3801_s3 = inlined_call_operand.vmem [shape: f32[1,128], index: 3, kind: input, shape index: {}]   ;;  %s3802_s4 = inlined_call_operand.hbm [shape: f32[3,3,128], index: 4, kind: input, shape index: {}]   ;;  %s3803_s5 = inlined_call_operand.vmem [shape: f32[1,128], index: 5, kind: input, shape index: {}]   ;;  %s3804_s6 = inlined_call_operand.hbm [shape: bf16[128,128], index: 6, kind: input, shape index: {}]   ;;  %s3805_s7 = inlined_call_operand.vmem [shape: f32[1,128], index: 7, kind: input, shape index: {}]   ;;  %s3806_s8 = inlined_call_operand.vmem [shape: f32[1,128], index: 8, kind: input, shape index: {}]   ;;  %s3807_s9 = inlined_call_operand.hbm [shape: f32[2,16,16,128], index: 9, kind: output, shape index: {}]  }
   0x1   :  { %3820 = sst [smem:[#allocation23_spill]] %s3799_s1 }
   0x2   :  { %3821 = sst [smem:[#allocation24_spill]] %s3802_s4 }
   0x3   :  { %3822 = sst [smem:[#allocation25_spill]] %s3804_s6 }
   0x4   :  { %3823 = sst [smem:[#allocation26_spill]] %s3805_s7 }
   0x5   :  { %3824 = sst [smem:[#allocation27_spill]] %s3806_s8 }
   0x6   :  { %3825 = sst [smem:[#allocation28_spill]] %s3807_s9 }
   0x7   :  { %14 = vsyncpa [#allocation4], 0 }
   0x8   :  { %16 = vsyncpa [#allocation4 + $0x1], 0 }
   0x9   :  { %17 = vsyncpa [#allocation7], 0 }
   0xa   :  { %18 = vsyncpa [#allocation10], 0 }
   0xb   :  { %19 = vsyncpa [#allocation5], 0 }
   0xc   :  { %21 = vsyncpa [#allocation5 + $0x1], 0  ;;  %s2657_s30 = smov 0   ;;  %s2659_s10 = smov 0  }
   0xd   :  { %s2661_s11 = smov 0   ;;  %s2663_s12 = smov 0  }
   0xe   :  { %s2665_s13 = smov 0   ;;  %s2667_s14 = smov 0  }
   0xf   :  { %s2669_s15 = smov 0   ;;  %s2671_s16 = smov 0  }
  0x10   :  { %s2673_s17 = smov 0   ;;  %s2675_s18 = smov 0  }
  0x11   :  { %s2677_s19 = smov 0  }
  0x12 LB: > { %3826 = sst [smem:[#allocation16_spill]] %s2552_s30  ;;  %s1973_s20 = sadd.s32 4294967295, %s2592_s19   ;;  %s2592_s19 = sphi %s2677_s19, %s27_s19   ;;  %s2588_s18 = sphi %s2675_s18, %s3920_s18   ;;  %s2584_s17 = sphi %s2673_s17, %s3911_s17   ;;  %s2580_s16 = sphi %s2671_s16, %s3919_s16   ;;  %s2576_s15 = sphi %s2669_s15, %s3910_s15   ;;  %s2572_s14 = sphi %s2667_s14, %s3918_s14   ;;  %s2568_s13 = sphi %s2665_s13, %s3917_s13   ;;  %s2564_s12 = sphi %s2663_s12, %s3916_s12   ;;  %s2560_s11 = sphi %s2661_s11, %s3915_s11   ;;  %s2556_s10 = sphi %s2659_s10, %s3914_s10   ;;  %s2552_s30 = sphi %s2657_s30, %s3913_s30  }
  0x13   : > { %3827 = sst [smem:[#allocation17_spill]] %s2580_s16  ;;  %s1974_s21 = sadd.s32 4294967294, %s2592_s19  }
  0x14   : > { %3828 = sst [smem:[#allocation18_spill]] %s2584_s17  ;;  %p59_p0 = scmp.ne.s32.totalorder %s2568_s13, %s2564_s12 }
  0x15   : > { %p2713_p1 = scmp.eq.s32.totalorder %s1973_s20, 0  ;;  %p252_p2 = scmp.ne.s32.totalorder %s2560_s11, %s2556_s10 }
  0x16   : > { %p253_p4 = scmp.eq.s32.totalorder %s1973_s20, 3  ;;  %p258_p5 = scmp.ne.s32.totalorder %s2556_s10, %s2552_s30 }
  0x17   : > { %s3829_s22 = scalar_select %p2713_p1, 1, 0 }
  0x18   : > { %p2722_p3 = por %p2713_p1, %p59_p0  ;;  %p259_p6 = scmp.eq.s32.totalorder %s1974_s21, 3 }
  0x19   : > { %p2728_p7 = por %p253_p4, %p252_p2  ;;  %p1975_p8 = scmp.ge.s32.totalorder %s2592_s19, 1 }
  0x1a   : > { %s3830_s24 = scalar_select %p2722_p3, 1, 0 }
  0x1b   : > { %s3831_s25 = scalar_select %p2728_p7, 1, 0 }
  0x1c   : > { %p2733_p9 = por %p259_p6, %p258_p5  ;;  %p266_p10 = scmp.lt.s32.totalorder %s2592_s19, 5 }
  0x1d   : > { %3832 = sst [smem:[#allocation19_spill]] %s3831_s25  ;;  %s2594_s28 = smov [#allocation6]  }
  0x1e   : > { %s3833_s26 = scalar_select %p2733_p9, 1, 0 }
  0x1f   : > { %p2738_p11 = pnand %p1975_p8, %p266_p10  ;;  %s278_s29 = sshll.u32 %s2594_s28, 4  ;;  %s279_s29 = int_to_ptr.vmem [resolvable:$true] %s278_s29 }
  0x20   : > { %3834 = sst [smem:[#allocation20_spill]] %s3833_s26  ;;  %s2595_s20 = smov [#allocation8]  }
  0x21   : > { %p2217_p12 = pneg %p2738_p11  ;;  %s297_s21 = sshll.u32 %s2595_s20, 4  ;;  %s298_s21 = int_to_ptr.vmem [resolvable:$true] %s297_s21 }
  0x22   : > { %s2596_s23 = smov [#allocation9]   ;;  %s2369_s30 = scalar_lea.vmem %s279_s29, 1024 }
  0x23   : > { %p2746_p13 = pnand %p2217_p12, %p2713_p1  ;;  %s313_s26 = sshll.u32 %s2596_s23, 4  ;;  %s314_s26 = int_to_ptr.vmem [resolvable:$true] %s313_s26 }
  0x24   : > { %p2370_p2 = scmp.ne.s32.totalorder %s279_s29, %s2369_s30  ;;  %p2377_p6 = scmp.lt.s32.totalorder %s279_s29, %s279_s29 }
  0x25   : > { %p2360_p0 = pneg %p2746_p13  ;;  %p2378_p8 = scmp.lt.s32.totalorder %s2369_s30, %s2369_s30 }
  0x27   : > { %p2372_p4 = pnand %p2370_p2, %p2360_p0  ;;  %p2379_p10 = por %p2378_p8, %p2377_p6 }
  0x29   : > { %p2373_p5 = pneg %p2372_p4 }
  0x2b   : > { %p2380_p12 = pnand %p2379_p10, %p2373_p5 }
  0x2d   : > { %2383 = shalt.err (!%p2380_p12)
}
  0x2e   : > { %s2597_s28 = smov 64   ;;  %s2598_s20 = smov 4  }
  0x2f   : > { %s3837_s1 = sld [smem:[#allocation23_spill]]  ;;  %s2395_s25 = scalar_lea.vmem %s298_s21, 192 }
  0x30   : > { %p2396_p9 = scmp.ne.s32.totalorder %s298_s21, %s2395_s25  ;;  %p2403_p7 = scmp.lt.s32.totalorder %s298_s21, %s298_s21 }
  0x31   : > { %p2404_p1 = scmp.lt.s32.totalorder %s2395_s25, %s2395_s25 }
  0x32   : > { %p2398_p2 = pnand %p2396_p9, %p2360_p0 }
  0x33   : > { %p2405_p6 = por %p2404_p1, %p2403_p7 }
  0x34   : > { %p2399_p4 = pneg %p2398_p2 }
  0x35   : > { %2220 = dma.hbm_to_vmem [thread:$0]  (!%p2746_p13), %s3837_s1, 1024, %s279_s29, [#allocation7], %s2597_s28, %s2597_s28, %s2598_s20  }
  0x36   : > { %p2406_p5 = pnand %p2405_p6, %p2399_p4 }
  0x38   : > { %2409 = shalt.err (!%p2406_p5)
}
  0x39   : > { %s3838_s4 = sld [smem:[#allocation24_spill]]  ;;  %s2421_s9 = scalar_lea.vmem %s314_s26, 1024 }
  0x3a   : > { %p2422_p8 = scmp.ne.s32.totalorder %s314_s26, %s2421_s9  ;;  %p2429_p12 = scmp.lt.s32.totalorder %s314_s26, %s314_s26 }
  0x3b   : > { %p2430_p2 = scmp.lt.s32.totalorder %s2421_s9, %s2421_s9 }
  0x3c   : > { %p2424_p10 = pnand %p2422_p8, %p2360_p0 }
  0x3d   : > { %p2431_p3 = por %p2430_p2, %p2429_p12 }
  0x3e   : > { %p2425_p9 = pneg %p2424_p10 }
  0x3f   : > { %2223 = dma.hbm_to_vmem [thread:$0]  (!%p2746_p13), %s3838_s4, 192, %s298_s21, [#allocation7], %s2597_s28, %s2597_s28, %s2598_s20  }
  0x40   : > { %p2432_p1 = pnand %p2431_p3, %p2425_p9 }
  0x42   : > { %2435 = shalt.err (!%p2432_p1)
}
  0x43   : > { %s3839_s6 = sld [smem:[#allocation25_spill]]  ;;  %s36_s16 = sadd.s32 1, %s2584_s17 }
  0x44   : > { %p37_p3 = scmp.ge.s32.totalorder %s36_s16, 2  ;;  %s39_s21 = sadd.s32 1, %s2588_s18 }
  0x45   : > { %s46_s12 = sadd.s32 1, %s2572_s14  ;;  %p53_p7 = scmp.ne.s32.totalorder %s2572_s14, %s2568_s13 }
  0x46   : > { %s3922_s16 = smov (%p37_p3, %s36_s16), 0  ;;  %s3924_s21 = smov (!%p37_p3, %s39_s21), %s2588_s18 }
  0x47   : > { %3840 = sst [smem:[#allocation21_spill]] %s3922_s16  ;;  %p54_p0 = scmp.eq.s32.totalorder %s2592_s19, 0 }
  0x48   : > { %s238_s23 = ssub.s32 %s2584_s17, %s3922_s16  ;;  %p41_p4 = scmp.ge.s32.totalorder %s3924_s21, 2 }
  0x49   : > { %2226 = dma.hbm_to_vmem [thread:$0]  (!%p2746_p13), %s3839_s6, 1024, %s314_s26, [#allocation10], %s2597_s28, %s2597_s28, %s2598_s20  }
  0x4a   : > { %p2238_p6 = scmp.lt.s32.totalorder %s2592_s19, 4  ;;  %p2788_p13 = por %p54_p0, %p53_p7 }
  0x4b   : > { %s333_s28 = sand.u32 1, %s2572_s14   ;;  %s3926_s21 = smov (%p41_p4, %s3924_s21), 0 }
  0x4c   : > { %3842 = sst [smem:[#allocation22_spill]] %s3926_s21  ;;  %s2198_s20 = smul.u32 432, %s333_s28 }
  0x4d   : > { %s43_s30 = ssub.s32 %s2588_s18, %s3926_s21  ;;  %s2199_s9 = smul.u32 6912, %s2588_s18 }
  0x4e   : > { %p44_p5 = scmp.eq.s32.totalorder %s43_s30, 0  ;;  %s239_s25 = sor.u32 %s238_s23, %s43_s30 }
  0x4f   : > { %p240_p8 = scmp.eq.s32.totalorder %s239_s25, 0  ;;  %s3843_s1 = sadd.s32 1, %s2560_s11 }
  0x50   : > { %s2799_s29 = scalar_select %p44_p5, %s2572_s14, %s46_s12  }
  0x51   : > { %s2804_s4 = scalar_select %p240_p8, %s2560_s11, %s3843_s1  }
  0x52   : > { %s343_s17 = scalar_lea.hbm %s3798_s0, %s2199_s9  ;;  %s337_s8 = scalar_lea.vmem [#allocation3], %s2198_s20 }
  0x53   : > { %s344_s7 = sshll.u32 %s337_s8, 4  ;;  %p2813_p10 = pnand %p2238_p6, %p2788_p13  ;;  %s345_s7 = int_to_ptr.vmem [resolvable:$true] %s344_s7 }
  0x54   : > { %s334_s23 = scalar_lea.sflag [#allocation4], %s333_s28  ;;  %s2449_s12 = scalar_lea.vmem %s345_s7, 6912 }
  0x55   : > { %p2438_p9 = pneg %p2813_p10  ;;  %p2450_p12 = scmp.ne.s32.totalorder %s345_s7, %s2449_s12 }
  0x56   : > { %s2599_s1 = smov [#allocation3]  }
  0x57   : > { %p2452_p2 = pnand %p2450_p12, %p2438_p9  ;;  %s2454_s6 = sshll.u32 %s2599_s1, 4  ;;  %s2455_s6 = int_to_ptr.vmem [resolvable:$false] %s2454_s6 }
  0x58   : > { %s2456_s16 = scalar_lea.vmem %s2455_s6, 13824  ;;  %p2457_p3 = scmp.lt.s32.totalorder %s345_s7, %s2455_s6 }
  0x59   : > { %p2453_p1 = pneg %p2452_p2  ;;  %p2458_p7 = scmp.lt.s32.totalorder %s2456_s16, %s2449_s12 }
  0x5b   : > { %p2459_p0 = por %p2458_p7, %p2457_p3 }
  0x5d   : > { %p2460_p4 = pnand %p2459_p0, %p2453_p1 }
  0x5f   : > { %2463 = shalt.err (!%p2460_p4)
}
  0x60   : > { %s2600_s8 = smov 128   ;;  %s2601_s26 = smov 8  }
  0x61   : > { %2230 = dma.hbm_to_vmem [thread:$0]  (!%p2813_p10), %s343_s17, 6912, %s345_s7, %s334_s23, %s2600_s8, %s2600_s8, %s2601_s26  }
  0x62   : > { %356 = sbr.rel (%p2738_p11) target bundleno = 697 (0x2b9), region = 56  ;;  %s358_s28 = sand.u32 (!%p2738_p11), 1, %s2568_s13  }
  0x63   : > { %s2824_s20 = smul.u32 (!%p2738_p11), 432, %s358_s28  ;;  %s359_s30 = scalar_lea.sflag (!%p2738_p11), [#allocation4], %s358_s28 }
  0x64   : > { %p3845_p6 = scmp.ne.s32.totalorder (!%p2738_p11), %s3830_s24, 0 }
  0x65   : > { %s362_s9 = scalar_lea.vmem (!%p2738_p11), [#allocation3], %s2824_s20 }
  0x67   : > { %2535 = dma.done.wait (%p3845_p6), %s359_s30, 6912  }
  0x68   : > { %2537 = vsyncadd (%p3845_p6), %s359_s30, 4294960384  ;;  %p3846_p13 = scmp.ne.s32.totalorder %s3829_s22, 0 }
  0x6a   : > { %2539 = dma.done.wait (%p3846_p13), [#allocation7], 1216  }
  0x6b   : > { %2541 = vsyncadd (%p3846_p13), [#allocation7], 4294966080 }
  0x6c   : > { %2543 = dma.done.wait (%p3846_p13), [#allocation10], 1024  }
  0x6d   : > { %2545 = vsyncadd (%p3846_p13), [#allocation10], 4294966272  ;;  %v2602_v0 = vmov 0.0   ;;  %vm2603_vm0 = vmmov 0   ;;  %v2342_v1 = vld [vmem:[#allocation6 + $0x38] sm:$0xff]   ;;  %v2343_v2 = vld [vmem:[#allocation6 + $0x30] sm:$0xff]   ;;  %v820_v62 = vlaneseq }
  0x6e   : > { %2074 = vmatprep.subr.bf16.mxu0 %v2602_v0  ;;  %2182 = vmatprep.subr.bf16.mxu1 %v2602_v0  ;;  %v2344_v3 = vld [vmem:[#allocation6 + $0x28] sm:$0xff]   ;;  %v2345_v4 = vld [vmem:[#allocation6 + $0x20] sm:$0xff]   ;;  %v2346_v5 = vld [vmem:[#allocation6 + $0x18] sm:$0xff]   ;;  %s1987_s7 = smul.u32 192, %s2576_s15  ;;  %s1986_s22 = sshll.u32 %s2576_s15, 3 }
  0x6f   : > { %2090 = vmatprep.mubr.msk.bf16.mxu0 %vm2603_vm0, %v2602_v0  ;;  %2130 = vmatprep.mubr.msk.bf16.mxu1 %vm2603_vm0, %v2602_v0  ;;  %v2347_v6 = vld [vmem:[#allocation6 + $0x10] sm:$0xff]   ;;  %v2348_v7 = vld [vmem:[#allocation6 + $0x8] sm:$0xff]   ;;  %v2349_v8 = vld [vmem:[#allocation6] sm:$0xff]   ;;  %v2921_v63 = vstv %s1986_s22  ;;  %s406_s1 = sand.u32 1, %s2556_s10   ;;  %s3901_s8 = sld [smem:[#allocation26_spill]] }
  0x70   : > { %2075 = vmatpush3.bf16.msra.mxu0 %v2342_v1  ;;  %2190 = vmatpush3.bf16.msra.mxu1 %v2342_v1  ;;  %s2858_s17 = scalar_lea.vmem %s362_s9, %s1987_s7 [#allocation3]  ;;  %v2350_v54 = vld [vmem:[#allocation9 + $0x38] sm:$0xff]   ;;  %v2351_v55 = vld [vmem:[#allocation9 + $0x30] sm:$0xff]   ;;  %v2352_v56 = vld [vmem:[#allocation9 + $0x28] sm:$0xff]   ;;  %vm824_vm1 = vcmp.eq.s32.totalorder %v2921_v63, 0  ;;  %vm834_vm2 = vcmp.ge.s32.totalorder %v2921_v63, 17  ;;  %s3902_s20 = sld [smem:[#allocation27_spill]] }
  0x71   : > { %2076 = vmatprep.subr.bf16.mxu0 %v2602_v0  ;;  %2183 = vmatprep.subr.bf16.mxu1 %v2602_v0  ;;  %v414_v9 = vld [vmem:[%s2858_s17] sm:$0xff]  ;;  %v415_v10 = vld [vmem:[%s2858_s17 + $0x8] sm:$0xff]  ;;  %v416_v15 = vld [vmem:[%s2858_s17 + $0x10] sm:$0xff]  ;;  %s1985_s30 = sshll.u32 %s406_s1, 7  ;;  %s3903_s7 = sld [smem:[#allocation17_spill]] }
  0x72   : > { %v434_v11 = vld [vmem:[%s2858_s17 + $0xa0] sm:$0xff]  ;;  %v435_v12 = vld [vmem:[%s2858_s17 + $0xa8] sm:$0xff]  ;;  %v444_v13 = vpack.c.bf16 %v415_v10, %v414_v9  ;;  %v417_v16 = vld [vmem:[%s2858_s17 + $0x18] sm:$0xff]  ;;  %s3668_s9 = scalar_lea.vmem [#allocation11], %s1985_s30  ;;  %s2034_s22 = sshll.u32 %s2576_s15, 4 }
  0x73   : > { %v454_v14 = vpack.c.bf16 %v435_v12, %v434_v11  ;;  %v436_v17 = vld [vmem:[%s2858_s17 + $0xb0] sm:$0xff]  ;;  %v437_v18 = vld [vmem:[%s2858_s17 + $0xb8] sm:$0xff]  ;;  %v445_v19 = vpack.c.bf16 %v417_v16, %v416_v15  ;;  %v418_v21 = vld [vmem:[%s2858_s17 + $0x20] sm:$0xff]  ;;  %s3904_s15 = sld [smem:[#allocation19_spill]]  ;;  %s1851_s25 = sshll.u32 %s3668_s9, 4  ;;  %s3732_s25 = int_to_ptr.vmem [resolvable:$true] %s1851_s25 }
  0x74   : > { %2077 = vmatpush3.bf16.msra.mxu0 %v2343_v2  ;;  %2191 = vmatpush3.bf16.msra.mxu1 %v2343_v2  ;;  %v455_v20 = vpack.c.bf16 %v437_v18, %v436_v17  ;;  %v419_v22 = vld [vmem:[%s2858_s17 + $0x28] sm:$0xff]  ;;  %v438_v23 = vld [vmem:[%s2858_s17 + $0xc0] sm:$0xff]  ;;  %v420_v27 = vld [vmem:[%s2858_s17 + $0x30] sm:$0xff]  ;;  %v2929_v2 = vshrl.u32 %v820_v62, 7  ;;  %s3905_s6 = sld [smem:[#allocation28_spill]]  ;;  %s2604_s26 = smov [#allocation11]  }
  0x75   : > { %2078 = vmatprep.subr.bf16.mxu0 %v2602_v0  ;;  %2184 = vmatprep.subr.bf16.mxu1 %v2602_v0  ;;  %v439_v24 = vld [vmem:[%s2858_s17 + $0xc8] sm:$0xff]  ;;  %v446_v25 = vpack.c.bf16 %v419_v22, %v418_v21  ;;  %v421_v28 = vld [vmem:[%s2858_s17 + $0x38] sm:$0xff]  ;;  %v440_v29 = vld [vmem:[%s2858_s17 + $0xd0] sm:$0xff]  ;;  %s2468_s28 = sshll.u32 %s2604_s26, 4  ;;  %s2469_s28 = int_to_ptr.vmem [resolvable:$false] %s2468_s28 }
  0x76   : > { %v456_v26 = vpack.c.bf16 %v439_v24, %v438_v23  ;;  %v441_v30 = vld [vmem:[%s2858_s17 + $0xd8] sm:$0xff]  ;;  %v447_v31 = vpack.c.bf16 %v421_v28, %v420_v27  ;;  %v422_v33 = vld [vmem:[%s2858_s17 + $0x40] sm:$0xff]  ;;  %v423_v34 = vld [vmem:[%s2858_s17 + $0x48] sm:$0xff]  ;;  %vm854_vm6 = vcmp.eq.s32.totalorder %v2929_v2, 0  ;;  %v1061_v11 = vsub.s32 0, %v2929_v2  ;;  %p2471_p9 = scmp.lt.s32.totalorder %s3732_s25, %s2469_s28 }
  0x77   : > { %v457_v32 = vpack.c.bf16 %v441_v30, %v440_v29  ;;  %v442_v35 = vld [vmem:[%s2858_s17 + $0xe0] sm:$0xff]  ;;  %v443_v36 = vld [vmem:[%s2858_s17 + $0xe8] sm:$0xff]  ;;  %v448_v37 = vpack.c.bf16 %v423_v34, %v422_v33  ;;  %v424_v39 = vld [vmem:[%s2858_s17 + $0x50] sm:$0xff]  ;;  %v1113_v16 = vsub.s32 1, %v2929_v2  ;;  %s2030_s24 = sshll.u32 %s3903_s7, 5 }
  0x78   : > { %2079 = vmatpush3.bf16.msra.mxu0 %v2344_v3  ;;  %2192 = vmatpush3.bf16.msra.mxu1 %v2344_v3  ;;  %v458_v38 = vpack.c.bf16 %v443_v36, %v442_v35  ;;  %v425_v40 = vld [vmem:[%s2858_s17 + $0x58] sm:$0xff]  ;;  %v426_v42 = vld [vmem:[%s2858_s17 + $0x60] sm:$0xff]  ;;  %v427_v43 = vld [vmem:[%s2858_s17 + $0x68] sm:$0xff]  ;;  %s1848_s27 = sadd.s32 %s2034_s22, %s2030_s24 }
  0x79   : > { %2080 = vmatprep.subr.bf16.mxu0 %v2602_v0  ;;  %2185 = vmatprep.subr.bf16.mxu1 %v2602_v0  ;;  %v449_v41 = vpack.c.bf16 %v425_v40, %v424_v39  ;;  %v450_v44 = vpack.c.bf16 %v427_v43, %v426_v42  ;;  %v428_v45 = vld [vmem:[%s2858_s17 + $0x70] sm:$0xff]  ;;  %v429_v46 = vld [vmem:[%s2858_s17 + $0x78] sm:$0xff]  ;;  %v430_v48 = vld [vmem:[%s2858_s17 + $0x80] sm:$0xff]  ;;  %s2031_s21 = sshll.u32 %s1848_s27, 7  ;;  %p3906_p5 = scmp.ne.s32.totalorder %s3904_s15, 0 }
  0x7a   : > { %v451_v47 = vpack.c.bf16 %v429_v46, %v428_v45  ;;  %v431_v49 = vld [vmem:[%s2858_s17 + $0x88] sm:$0xff]  ;;  %v432_v51 = vld [vmem:[%s2858_s17 + $0x90] sm:$0xff]  ;;  %v433_v52 = vld [vmem:[%s2858_s17 + $0x98] sm:$0xff]  ;;  %s3730_s16 = scalar_lea.hbm %s3905_s6, %s2031_s21 }
  0x7b   : > { %v452_v50 = vpack.c.bf16 %v431_v49, %v430_v48  ;;  %v453_v53 = vpack.c.bf16 %v433_v52, %v432_v51  ;;  %v2353_v57 = vld [vmem:[#allocation9 + $0x20] sm:$0xff]   ;;  %v2354_v58 = vld [vmem:[#allocation9 + $0x18] sm:$0xff]   ;;  %v2355_v59 = vld [vmem:[#allocation9 + $0x10] sm:$0xff]  }
  0x7c   : > { %2081 = vmatpush3.bf16.msra.mxu0 %v2345_v4  ;;  %2193 = vmatpush3.bf16.msra.mxu1 %v2345_v4  ;;  %v2356_v60 = vld [vmem:[#allocation9 + $0x8] sm:$0xff]   ;;  %v2357_v61 = vld [vmem:[#allocation9] sm:$0xff]   ;;  %vm2944_vm5 = vmor %vm824_vm1, %vm834_vm2 }
  0x7d   : > { %2082 = vmatprep.subr.bf16.mxu0 %v2602_v0  ;;  %2186 = vmatprep.subr.bf16.mxu1 %v2602_v0  ;;  %v2927_v1 = vld [vmem:[%s3800_s2] ss:$0 sm:$0xff]  ;;  %v1040_v15 = vld [vmem:[#allocation8] sm:$0x7]  ;;  %vm2963_vm11 = vmor %vm2944_vm5, %vm854_vm6 }
  0x7e   : > { %v2936_v4 = vld [vmem:[%s3801_s3] ss:$0 sm:$0xff]  ;;  %v1041_v24 = vld [vmem:[#allocation8 + $0x4] sm:$0x7]  ;;  %v2969_v29 = vrot.slane %v1040_v15, %v1061_v11 }
  0x7f   : > { %v2986_v40 = vrot.slane %v1041_v24, %v1061_v11  ;;  %v3004_v49 = vrot.slane %v1041_v24, %v1113_v16 }
  0x80   : > { %2083 = vmatpush3.bf16.msra.mxu0 %v2346_v5  ;;  %2194 = vmatpush3.bf16.msra.mxu1 %v2346_v5  ;;  %v2939_v5 = vadd.s32 16, %v2929_v2 }
  0x81   : > { %2084 = vmatprep.subr.bf16.mxu0 %v2602_v0  ;;  %2187 = vmatprep.subr.bf16.mxu1 %v2602_v0 }
  0x82   : > { %vm889_vm8 = vcmp.ge.s32.totalorder %v2939_v5, 17 }
  0x83   : > { %vm3029_vm1 = vmor %vm2944_vm5, %vm889_vm8 }
  0x84   : > { %2085 = vmatpush3.bf16.msra.mxu0 %v2347_v6  ;;  %2195 = vmatpush3.bf16.msra.mxu1 %v2347_v6 }
  0x85   : > { %2086 = vmatprep.subr.bf16.mxu0 %v2602_v0  ;;  %2188 = vmatprep.subr.bf16.mxu1 %v2602_v0 }
  0x88   : > { %2087 = vmatpush3.bf16.msra.mxu0 %v2348_v7  ;;  %2196 = vmatpush3.bf16.msra.mxu1 %v2348_v7  ;;  %v817_v7 = vadd.s32 7, %v2921_v63 }
  0x89   : > { %2088 = vmatprep.subr.bf16.mxu0 %v2602_v0  ;;  %2189 = vmatprep.subr.bf16.mxu1 %v2602_v0 }
  0x8a   : > { %vm831_vm9 = vcmp.eq.s32.totalorder %v817_v7, 0  ;;  %vm841_vm10 = vcmp.ge.s32.totalorder %v817_v7, 17 }
  0x8b   : > { %vm2992_vm13 = vmor %vm831_vm9, %vm841_vm10 }
  0x8c   : > { %2089 = vmatpush3.bf16.msra.mxu0 %v2349_v8  ;;  %2197 = vmatpush3.bf16.msra.mxu1 %v2349_v8 }
  0x8d   : > { %2150 = vmatprep.subr.bf16.mxu1 %v2350_v54 }
  0x8f   : > { %2091 = vmatmul.mubr.bf16.vlgmr.msra.gmra.mxu0 %v444_v13  ;;  %2131 = vmatmul.mubr.bf16.vlgmr.msra.gmra.mxu1 %v454_v14 }
  0x90   : > { %2094 = vmatprep.mubr.msk.bf16.mxu0 %vm2603_vm0, %v2602_v0  ;;  %2134 = vmatprep.mubr.msk.bf16.mxu1 %vm2603_vm0, %v2602_v0 }
  0x91   : > { %2151 = vmatpush3.bf16.msra.mxu1 %v2350_v54 }
  0x92   : > { %2152 = vmatprep.subr.bf16.mxu1 %v2351_v55 }
  0x95   : > { %2153 = vmatpush3.bf16.msra.mxu1 %v2351_v55 }
  0x96   : > { %2154 = vmatprep.subr.bf16.mxu1 %v2352_v56 }
  0x97   : > { %2095 = vmatmul.mubr.bf16.gmra.mxu0 %v445_v19  ;;  %2135 = vmatmul.mubr.bf16.gmra.mxu1 %v455_v20  ;;  %v1165_v19 = vsub.s32 2, %v2929_v2 }
  0x98   : > { %2098 = vmatprep.mubr.msk.bf16.mxu0 %vm2603_vm0, %v2602_v0  ;;  %2138 = vmatprep.mubr.msk.bf16.mxu1 %vm2603_vm0, %v2602_v0 }
  0x99   : > { %2155 = vmatpush3.bf16.msra.mxu1 %v2352_v56  ;;  %v2984_v39 = vrot.slane %v1040_v15, %v1165_v19  ;;  %v3009_v56 = vadd.s32 2, %v2921_v63 }
  0x9a   : > { %2156 = vmatprep.subr.bf16.mxu1 %v2353_v57 }
  0x9b   : > { %vm836_vm10 = vcmp.ge.s32.totalorder %v3009_v56, 17 }
  0x9d   : > { %2157 = vmatpush3.bf16.msra.mxu1 %v2353_v57 }
  0x9e   : > { %2158 = vmatprep.subr.bf16.mxu1 %v2354_v58 }
  0x9f   : > { %2099 = vmatmul.mubr.bf16.gmra.mxu0 %v446_v25  ;;  %2139 = vmatmul.mubr.bf16.gmra.mxu1 %v456_v26  ;;  %v1042_v25 = vld [vmem:[#allocation8 + $0x8] sm:$0x7] }
  0xa0   : > { %2102 = vmatprep.mubr.msk.bf16.mxu0 %vm2603_vm0, %v2602_v0  ;;  %2142 = vmatprep.mubr.msk.bf16.mxu1 %vm2603_vm0, %v2602_v0 }
  0xa1   : > { %2159 = vmatpush3.bf16.msra.mxu1 %v2354_v58  ;;  %v3019_v58 = vrot.slane %v1041_v24, %v1165_v19  ;;  %v3051_v24 = vadd.s32 9, %v2921_v63 }
  0xa2   : > { %2160 = vmatprep.subr.bf16.mxu1 %v2355_v59 }
  0xa5   : > { %2161 = vmatpush3.bf16.msra.mxu1 %v2355_v59 }
  0xa6   : > { %2162 = vmatprep.subr.bf16.mxu1 %v2356_v60 }
  0xa7   : > { %2103 = vmatmul.mubr.bf16.gmra.mxu0 %v447_v31  ;;  %2143 = vmatmul.mubr.bf16.gmra.mxu1 %v457_v32  ;;  %v811_v31 = vadd.s32 1, %v2921_v63  ;;  %v3066_v32 = vadd.s32 3, %v2921_v63 }
  0xa8   : > { %2106 = vmatprep.mubr.msk.bf16.mxu0 %vm2603_vm0, %v2602_v0  ;;  %2146 = vmatprep.mubr.msk.bf16.mxu1 %vm2603_vm0, %v2602_v0 }
  0xa9   : > { %2163 = vmatpush3.bf16.msra.mxu1 %v2356_v60  ;;  %vm825_vm14 = vcmp.eq.s32.totalorder %v811_v31, 0  ;;  %vm835_vm15 = vcmp.ge.s32.totalorder %v811_v31, 17 }
  0xaa   : > { %2164 = vmatprep.subr.bf16.mxu1 %v2357_v61  ;;  %vm3041_vm2 = vmor %vm825_vm14, %vm835_vm15  ;;  %vm843_vm14 = vcmp.ge.s32.totalorder %v3051_v24, 17 }
  0xab   : > { %vm3059_vm9 = vmor %vm3041_vm2, %vm854_vm6 }
  0xad   : > { %2165 = vmatpush3.bf16.msra.mxu1 %v2357_v61 }
  0xaf   : > { %2107 = vmatmul.mubr.bf16.gmra.mxu0 %v448_v37  ;;  %2147 = vmatmul.mubr.bf16.gmra.mxu1 %v458_v38  ;;  %v2982_v38 = vrot.slane %v1040_v15, %v1113_v16 }
  0xb0   : > { %2110 = vmatprep.mubr.msk.bf16.mxu0 %vm2603_vm0, %v2602_v0 }
  0xb7   : > { %2111 = vmatmul.mubr.bf16.gmra.mxu0 %v449_v41  ;;  %v2988_v41 = vrot.slane %v1042_v25, %v1061_v11  ;;  %v3035_v11 = vrot.slane %v1042_v25, %v1113_v16 }
  0xb8   : > { %2114 = vmatprep.mubr.msk.bf16.mxu0 %vm2603_vm0, %v2602_v0 }
  0xbf   : > { %2115 = vmatmul.mubr.bf16.gmra.mxu0 %v450_v44 }
  0xc0   : > { %2118 = vmatprep.mubr.msk.bf16.mxu0 %vm2603_vm0, %v2602_v0 }
  0xc7   : > { %2119 = vmatmul.mubr.bf16.gmra.mxu0 %v451_v47 }
  0xc8   : > { %2122 = vmatprep.mubr.msk.bf16.mxu0 %vm2603_vm0, %v2602_v0 }
  0xcf   : > { %2123 = vmatmul.mubr.bf16.gmra.mxu0 %v452_v50 }
  0xd0   : > { %2126 = vmatprep.mubr.msk.bf16.mxu0 %vm2603_vm0, %v2602_v0  ;;  %v816_v0 = vadd.s32 6, %v2921_v63  ;;  %vm3015_vm0 = vmor %vm2992_vm13, %vm854_vm6 }
  0xd2   : > { %vm830_vm3 = vcmp.eq.s32.totalorder %v816_v0, 0  ;;  %vm840_vm4 = vcmp.ge.s32.totalorder %v816_v0, 17  ;;  %v818_v0 = vadd.s32 8, %v2921_v63 }
  0xd3   : > { %vm2953_vm7 = vmor %vm830_vm3, %vm840_vm4  ;;  %vm826_vm3 = vcmp.eq.s32.totalorder %v3009_v56, 0 }
  0xd4   : > { %vm2976_vm12 = vmor %vm2953_vm7, %vm889_vm8  ;;  %vm832_vm4 = vcmp.eq.s32.totalorder %v818_v0, 0 }
  0xd7   : > { %2127 = vmatmul.mubr.bf16.gmra.mxu0 %v453_v53 }
 0x14f   : > { %v557_v3 = vpop.f32.mrf.mxu0  ;;  %v637_v6 = vpop.f32.mrf.mxu1 }
 0x150   : > { %v683_v8 = vmul.f32 %v2927_v1, %v557_v3  ;;  %v703_v9 = vmul.f32 %v2927_v1, %v637_v6 }
 0x151   : > { %v2092_v12 = vpop.f32.mrf.mxu0  ;;  %v2132_v13 = vpop.f32.mrf.mxu1 }
 0x152   : > { %v720_v14 = vadd.f32 %v2936_v4, %v683_v8  ;;  %v740_v17 = vadd.f32 %v2936_v4, %v703_v9  ;;  %v3037_v12 = vrot.slane %v1042_v25, %v1165_v19 }
 0x153   : > { %v560_v20 = vpop.f32.mrf.mxu0  ;;  %v640_v21 = vpop.f32.mrf.mxu1 }
 0x154   : > { %v750_v22 = vmax.f32 %v720_v14, 0.0  ;;  %v684_v26 = vmul.f32 %v2927_v1, %v560_v20  ;;  %v770_v27 = vmax.f32 %v740_v17, 0.0  ;;  %v704_v28 = vmul.f32 %v2927_v1, %v640_v21 }
 0x155   : > { %v2093_v30 = vpop.f32.mrf.mxu0  ;;  %v2133_v33 = vpop.f32.mrf.mxu1 }
 0x156   : > { %v780_v34 = vmin.f32 %v750_v22, 6.0  ;;  %v721_v35 = vadd.f32 %v2936_v4, %v684_v26  ;;  %v800_v36 = vmin.f32 %v770_v27, 6.0  ;;  %v741_v37 = vadd.f32 %v2936_v4, %v704_v28 }
 0x157   : > { %v565_v42 = vpop.f32.mrf.mxu0  ;;  %v645_v44 = vpop.f32.mrf.mxu1 }
 0x158   : > { %v2998_v45 = vsel %vm2963_vm11, 0.0, %v780_v34  ;;  %v751_v46 = vmax.f32 %v721_v35, 0.0  ;;  %v685_v47 = vmul.f32 %v2927_v1, %v565_v42  ;;  %v1000_v48 = vsel %vm2976_vm12, 0.0, %v800_v36  ;;  %vm3074_vm11 = vmor %vm2992_vm13, %vm889_vm8 }
 0x159   : > { %1010 = vst [vmem:[#allocation2] sm:$0xff] %v2998_v45  ;;  %v2096_v50 = vpop.f32.mrf.mxu0  ;;  %1030 = vst [vmem:[#allocation2 + $0xa0] sm:$0xff] %v1000_v48  ;;  %v771_v51 = vmax.f32 %v741_v37, 0.0  ;;  %v705_v52 = vmul.f32 %v2927_v1, %v645_v44  ;;  %v2136_v53 = vpop.f32.mrf.mxu1 }
 0x15a   : > { %v781_v54 = vmin.f32 %v751_v46, 6.0  ;;  %v722_v55 = vadd.f32 %v2936_v4, %v685_v47  ;;  %v3081_v46 = vadd.s32 4, %v2921_v63 }
 0x15b   : > { %v568_v59 = vpop.f32.mrf.mxu0  ;;  %v801_v60 = vmin.f32 %v771_v51, 6.0  ;;  %v742_v61 = vadd.f32 %v2936_v4, %v705_v52  ;;  %v648_v62 = vpop.f32.mrf.mxu1  ;;  %v3091_v51 = vadd.s32 5, %v2921_v63  ;;  %v1063_v52 = vmul.f32 %v2969_v29, %v2998_v45 }
 0x15c   : > { %v981_v3 = vsel %vm2944_vm5, 0.0, %v781_v54  ;;  %v752_v6 = vmax.f32 %v722_v55, 0.0  ;;  %v686_v8 = vmul.f32 %v2927_v1, %v568_v59  ;;  %v706_v9 = vmul.f32 %v2927_v1, %v648_v62 }
 0x15d   : > { %1011 = vst [vmem:[#allocation2 + $0x8] sm:$0xff] %v981_v3  ;;  %v2097_v10 = vpop.f32.mrf.mxu0  ;;  %v1001_v14 = vsel %vm3015_vm0, 0.0, %v801_v60  ;;  %v772_v15 = vmax.f32 %v742_v61, 0.0  ;;  %v2137_v17 = vpop.f32.mrf.mxu1  ;;  %vm842_vm5 = vcmp.ge.s32.totalorder %v818_v0, 17  ;;  %v1064_v53 = vmul.f32 %v2969_v29, %v981_v3  ;;  %vm3132_vm0 = vmor %vm3041_vm2, %vm889_vm8 }
 0x15e   : > { %v782_v20 = vmin.f32 %v752_v6, 6.0  ;;  %v723_v21 = vadd.f32 %v2936_v4, %v686_v8  ;;  %1031 = vst [vmem:[#allocation2 + $0xa8] sm:$0xff] %v1001_v14  ;;  %v743_v16 = vadd.f32 %v2936_v4, %v706_v9  ;;  %vm3086_vm12 = vmor %vm832_vm4, %vm842_vm5 }
 0x15f   : > { %v573_v19 = vpop.f32.mrf.mxu0  ;;  %v802_v22 = vmin.f32 %v772_v15, 6.0  ;;  %v653_v23 = vpop.f32.mrf.mxu1  ;;  %vm3111_vm15 = vmor %vm3086_vm12, %vm854_vm6 }
 0x160   : > { %v982_v25 = vsel %vm3029_vm1, 0.0, %v782_v20  ;;  %v753_v26 = vmax.f32 %v723_v21, 0.0  ;;  %v687_v28 = vmul.f32 %v2927_v1, %v573_v19  ;;  %v773_v30 = vmax.f32 %v743_v16, 0.0  ;;  %vm3142_vm1 = vmor %vm826_vm3, %vm836_vm10 }
 0x161   : > { %1012 = vst [vmem:[#allocation2 + $0x10] sm:$0xff] %v982_v25  ;;  %v2100_v31 = vpop.f32.mrf.mxu0  ;;  %v1002_v33 = vsel %vm2992_vm13, 0.0, %v802_v22  ;;  %v707_v35 = vmul.f32 %v2927_v1, %v653_v23  ;;  %v2140_v36 = vpop.f32.mrf.mxu1  ;;  %vm833_vm13 = vcmp.eq.s32.totalorder %v3051_v24, 0  ;;  %vm837_vm3 = vcmp.ge.s32.totalorder %v3066_v32, 17  ;;  %vm3164_vm4 = vmor %vm3142_vm1, %vm854_vm6 }
 0x162   : > { %v783_v37 = vmin.f32 %v753_v26, 6.0  ;;  %v724_v42 = vadd.f32 %v2936_v4, %v687_v28  ;;  %1032 = vst [vmem:[#allocation2 + $0xb0] sm:$0xff] %v1002_v33  ;;  %v803_v44 = vmin.f32 %v773_v30, 6.0  ;;  %vm3175_vm5 = vmor %vm3086_vm12, %vm889_vm8 }
 0x163   : > { %v576_v47 = vpop.f32.mrf.mxu0  ;;  %v744_v48 = vadd.f32 %v2936_v4, %v707_v35  ;;  %v656_v50 = vpop.f32.mrf.mxu1 }
 0x164   : > { %v983_v54 = vsel %vm3059_vm9, 0.0, %v783_v37  ;;  %v754_v55 = vmax.f32 %v724_v42, 0.0  ;;  %v688_v57 = vmul.f32 %v2927_v1, %v576_v47  ;;  %v1003_v59 = vsel %vm3074_vm11, 0.0, %v803_v44  ;;  %v1095_v63 = vld [vmem:[#allocation2 + $0x1] sm:$0xff]  ;;  %vm3196_vm9 = vmor %vm833_vm13, %vm843_vm14 }
 0x165   : > { %v1147_v60 = vld [vmem:[#allocation2 + $0x2] sm:$0xff]  ;;  %1013 = vst [vmem:[#allocation2 + $0x18] sm:$0xff] %v983_v54  ;;  %v2101_v61 = vpop.f32.mrf.mxu0  ;;  %1033 = vst [vmem:[#allocation2 + $0xb8] sm:$0xff] %v1003_v59  ;;  %v774_v45 = vmax.f32 %v744_v48, 0.0  ;;  %v708_v62 = vmul.f32 %v2927_v1, %v656_v50  ;;  %v2141_v0 = vpop.f32.mrf.mxu1  ;;  %v1115_v3 = vmul.f32 %v2982_v38, %v1095_v63  ;;  %v1220_v10 = vmul.f32 %v2986_v40, %v983_v54 }
 0x166   : > { %v1167_v6 = vmul.f32 %v2984_v39, %v1147_v60  ;;  %v784_v7 = vmin.f32 %v754_v55, 6.0  ;;  %v725_v8 = vadd.f32 %v2936_v4, %v688_v57  ;;  %v3117_v14 = vmul.f32 %v2969_v29, %v983_v54  ;;  %v3119_v15 = vld [vmem:[#allocation2 + $0xa8] sm:$0xff]  ;;  %vm3224_vm10 = vmor %vm3196_vm9, %vm854_vm6 }
 0x167   : > { %v581_v17 = vpop.f32.mrf.mxu0  ;;  %v804_v20 = vmin.f32 %v774_v45, 6.0  ;;  %v745_v21 = vadd.f32 %v2936_v4, %v708_v62  ;;  %v661_v16 = vpop.f32.mrf.mxu1  ;;  %v1131_v19 = vadd.f32 %v1115_v3, %v1063_v52  ;;  %v3124_v22 = vmul.f32 %v2988_v41, %v3119_v15  ;;  %vm3244_vm11 = vmor %vm3142_vm1, %vm889_vm8 }
 0x168   : > { %v984_v23 = vsel %vm3041_vm2, 0.0, %v784_v7  ;;  %v755_v25 = vmax.f32 %v725_v8, 0.0  ;;  %v689_v27 = vmul.f32 %v2927_v1, %v581_v17  ;;  %v709_v28 = vmul.f32 %v2927_v1, %v661_v16  ;;  %v1096_v30 = vld [vmem:[#allocation2 + $0x9] sm:$0xff] }
 0x169   : > { %v1148_v31 = vld [vmem:[#allocation2 + $0xa] sm:$0xff]  ;;  %1014 = vst [vmem:[#allocation2 + $0x20] sm:$0xff] %v984_v23  ;;  %v2104_v13 = vpop.f32.mrf.mxu0  ;;  %v1004_v34 = vsel %vm3111_vm15, 0.0, %v804_v20  ;;  %v775_v35 = vmax.f32 %v745_v21, 0.0  ;;  %v2144_v36 = vpop.f32.mrf.mxu1  ;;  %v1116_v37 = vmul.f32 %v2982_v38, %v1096_v30  ;;  %v1183_v48 = vadd.f32 %v1167_v6, %v1131_v19 }
 0x16a   : > { %v1168_v42 = vmul.f32 %v2984_v39, %v1148_v31  ;;  %v785_v44 = vmin.f32 %v755_v25, 6.0  ;;  %v726_v47 = vadd.f32 %v2936_v4, %v689_v27  ;;  %1034 = vst [vmem:[#allocation2 + $0xc0] sm:$0xff] %v1004_v34  ;;  %v746_v56 = vadd.f32 %v2936_v4, %v709_v28  ;;  %v3180_v17 = vld [vmem:[#allocation2 + $0xb0] sm:$0xff] }
 0x16b   : > { %v584_v50 = vpop.f32.mrf.mxu0  ;;  %vm827_vm2 = vcmp.eq.s32.totalorder %v3066_v32, 0  ;;  %v805_v52 = vmin.f32 %v775_v35, 6.0  ;;  %v664_v54 = vpop.f32.mrf.mxu1  ;;  %v1132_v55 = vadd.f32 %v1116_v37, %v1064_v53  ;;  %v1221_v57 = vmul.f32 %v2986_v40, %v984_v23  ;;  %v3187_v43 = vld [vmem:[#allocation2 + $0xa9] sm:$0xff] }
 0x16c   : > { %v3156_v59 = vmul.f32 %v2969_v29, %v984_v23  ;;  %v985_v63 = vsel %vm3132_vm0, 0.0, %v785_v44  ;;  %v756_v60 = vmax.f32 %v726_v47, 0.0  ;;  %v690_v45 = vmul.f32 %v2927_v1, %v584_v50  ;;  %v3189_v23 = vld [vmem:[#allocation2 + $0xb1] sm:$0xff]  ;;  %vm3286_vm0 = vmor %vm3196_vm9, %vm889_vm8 }
 0x16d   : > { %v776_v53 = vmax.f32 %v746_v56, 0.0  ;;  %1015 = vst [vmem:[#allocation2 + $0x28] sm:$0xff] %v985_v63  ;;  %v2105_v62 = vpop.f32.mrf.mxu0  ;;  %v1005_v0 = vsel %vm3086_vm12, 0.0, %v805_v52  ;;  %v710_v6 = vmul.f32 %v2927_v1, %v664_v54  ;;  %v2145_v7 = vpop.f32.mrf.mxu1  ;;  %v1184_v8 = vadd.f32 %v1168_v42, %v1132_v55  ;;  %vm3257_vm12 = vmor %vm827_vm2, %vm837_vm3 }
 0x16e   : > { %v1236_v9 = vadd.f32 %v1220_v10, %v1183_v48  ;;  %v786_v20 = vmin.f32 %v756_v60, 6.0  ;;  %v727_v21 = vadd.f32 %v2936_v4, %v690_v45  ;;  %1035 = vst [vmem:[#allocation2 + $0xc8] sm:$0xff] %v1005_v0  ;;  %v3185_v19 = vmul.f32 %v2988_v41, %v3180_v17  ;;  %vm3274_vm15 = vmor %vm3257_vm12, %vm854_vm6 }
 0x16f   : > { %v806_v16 = vmin.f32 %v776_v53, 6.0  ;;  %v589_v25 = vpop.f32.mrf.mxu0  ;;  %v747_v26 = vadd.f32 %v2936_v4, %v710_v6  ;;  %v669_v27 = vpop.f32.mrf.mxu1  ;;  %v1237_v28 = vadd.f32 %v1221_v57, %v1184_v8  ;;  %v3202_v30 = vmul.f32 %v3035_v11, %v3187_v43 }
 0x170   : > { %v3206_v31 = vmul.f32 %v3035_v11, %v3189_v23  ;;  %v3210_v13 = vsel %vm3164_vm4, 0.0, %v786_v20  ;;  %v757_v34 = vmax.f32 %v727_v21, 0.0  ;;  %v691_v24 = vmul.f32 %v2927_v1, %v589_v25  ;;  %v1252_v36 = vld [vmem:[#allocation2 + $0x19] sm:$0xff] }
 0x171   : > { %v1006_v35 = vsel %vm3175_vm5, 0.0, %v806_v16  ;;  %v1304_v37 = vld [vmem:[#allocation2 + $0x1a] sm:$0xff]  ;;  %1016 = vst [vmem:[#allocation2 + $0x30] sm:$0xff] %v3210_v13  ;;  %v2108_v42 = vpop.f32.mrf.mxu0  ;;  %v777_v44 = vmax.f32 %v747_v26, 0.0  ;;  %v711_v47 = vmul.f32 %v2927_v1, %v669_v27  ;;  %v2148_v56 = vpop.f32.mrf.mxu1  ;;  %v1272_v48 = vmul.f32 %v3004_v49, %v1252_v36 }
 0x172   : > { %1036 = vst [vmem:[#allocation2 + $0xd0] sm:$0xff] %v1006_v35  ;;  %v1324_v50 = vmul.f32 %v3019_v58, %v1304_v37  ;;  %v787_v52 = vmin.f32 %v757_v34, 6.0  ;;  %v728_v54 = vadd.f32 %v2936_v4, %v691_v24  ;;  %v1377_v57 = vmul.f32 %v2988_v41, %v3210_v13 }
 0x173   : > { %v1117_v63 = vmul.f32 %v1252_v36, %v2982_v38  ;;  %v592_v60 = vpop.f32.mrf.mxu0  ;;  %v807_v61 = vmin.f32 %v777_v44, 6.0  ;;  %v748_v45 = vadd.f32 %v2936_v4, %v711_v47  ;;  %v1288_v53 = vadd.f32 %v1272_v48, %v1236_v9  ;;  %v672_v62 = vpop.f32.mrf.mxu1 }
 0x174   : > { %v1169_v0 = vmul.f32 %v1304_v37, %v2984_v39  ;;  %v3235_v3 = vsel %vm3142_vm1, 0.0, %v787_v52  ;;  %v758_v6 = vmax.f32 %v728_v54, 0.0  ;;  %v692_v7 = vmul.f32 %v2927_v1, %v592_v60  ;;  %v1253_v8 = vld [vmem:[#allocation2 + $0x21] sm:$0xff]  ;;  %vm3330_vm1 = vmor %vm3257_vm12, %vm889_vm8 }
 0x175   : > { %v1305_v20 = vld [vmem:[#allocation2 + $0x22] sm:$0xff]  ;;  %v712_v21 = vmul.f32 %v2927_v1, %v672_v62  ;;  %1017 = vst [vmem:[#allocation2 + $0x38] sm:$0xff] %v3235_v3  ;;  %v2109_v16 = vpop.f32.mrf.mxu0  ;;  %v1007_v25 = vsel %vm3224_vm10, 0.0, %v807_v61  ;;  %v778_v26 = vmax.f32 %v748_v45, 0.0  ;;  %v1273_v27 = vmul.f32 %v3004_v49, %v1253_v8  ;;  %v2149_v24 = vpop.f32.mrf.mxu1 }
 0x176   : > { %v1325_v34 = vmul.f32 %v3019_v58, %v1305_v20  ;;  %v788_v35 = vmin.f32 %v758_v6, 6.0  ;;  %v729_v36 = vadd.f32 %v2936_v4, %v692_v7  ;;  %1037 = vst [vmem:[#allocation2 + $0xd8] sm:$0xff] %v1007_v25  ;;  %v1340_v37 = vadd.f32 %v1324_v50, %v1288_v53 }
 0x177   : > { %v1378_v42 = vmul.f32 %v2988_v41, %v3235_v3  ;;  %v597_v44 = vpop.f32.mrf.mxu0  ;;  %vm828_vm13 = vcmp.eq.s32.totalorder %v3081_v46, 0  ;;  %vm838_vm14 = vcmp.ge.s32.totalorder %v3081_v46, 17  ;;  %v808_v47 = vmin.f32 %v778_v26, 6.0 }
 0x178   : > { %v1289_v56 = vadd.f32 %v1273_v27, %v1237_v28  ;;  %v749_v48 = vadd.f32 %v2936_v4, %v712_v21  ;;  %v1118_v32 = vmul.f32 %v1253_v8, %v2982_v38  ;;  %v988_v52 = vsel %vm3244_vm11, 0.0, %v788_v35  ;;  %vm3342_vm2 = vmor %vm828_vm13, %vm838_vm14 }
 0x179   : > { %v759_v54 = vmax.f32 %v729_v36, 0.0  ;;  %v693_v50 = vmul.f32 %v2927_v1, %v597_v44  ;;  %v1393_v55 = vadd.f32 %v1377_v57, %v1340_v37  ;;  %1018 = vst [vmem:[#allocation2 + $0x40] sm:$0xff] %v988_v52  ;;  %v2112_v28 = vpop.f32.mrf.mxu0  ;;  %v1008_v61 = vsel %vm3196_vm9, 0.0, %v808_v47  ;;  %vm869_vm5 = vmor %vm3342_vm2, %vm854_vm6 }
 0x17a   : > { %v1341_v45 = vadd.f32 %v1325_v34, %v1289_v56  ;;  %v779_v53 = vmax.f32 %v749_v48, 0.0  ;;  %v1133_v62 = vadd.f32 %v1117_v63, %v3117_v14  ;;  %1038 = vst [vmem:[#allocation2 + $0xe0] sm:$0xff] %v1008_v61  ;;  %v1134_v8 = vadd.f32 %v1118_v32, %v3156_v59  ;;  %vm3401_vm9 = vmor %vm3342_vm2, %vm889_vm8 }
 0x17b   : > { %v789_v6 = vmin.f32 %v759_v54, 6.0  ;;  %v730_v57 = vadd.f32 %v2936_v4, %v693_v50  ;;  %v1170_v21 = vmul.f32 %v1305_v20, %v2984_v39  ;;  %v600_v9 = vpop.f32.mrf.mxu0  ;;  %v1222_v63 = vmul.f32 %v2986_v40, %v3210_v13 }
 0x17c   : > { %v1394_v16 = vadd.f32 %v1378_v42, %v1341_v45  ;;  %v809_v25 = vmin.f32 %v779_v53, 6.0  ;;  %v1185_v14 = vadd.f32 %v1169_v0, %v1133_v62  ;;  %v694_v27 = vmul.f32 %v2927_v1, %v600_v9  ;;  %v1409_v34 = vld [vmem:[#allocation2 + $0x31] sm:$0xff] }
 0x17d   : > { %v3296_v26 = vsel %vm3274_vm15, 0.0, %v789_v6  ;;  %v760_v10 = vmax.f32 %v730_v57, 0.0  ;;  %v3299_v24 = vld [vmem:[#allocation2 + $0x32] sm:$0xff]  ;;  %v1186_v59 = vadd.f32 %v1170_v21, %v1134_v8  ;;  %v2113_v20 = vpop.f32.mrf.mxu0  ;;  %v1429_v35 = vmul.f32 %v3035_v11, %v1409_v34 }
 0x17e   : > { %1019 = vst [vmem:[#allocation2 + $0x48] sm:$0xff] %v3296_v26  ;;  %v1481_v0 = vmul.f32 %v3037_v12, %v3299_v24  ;;  %v1009_v36 = vsel %vm3286_vm0, 0.0, %v809_v25  ;;  %v1223_v37 = vmul.f32 %v2986_v40, %v3235_v3  ;;  %v731_v44 = vadd.f32 %v2936_v4, %v694_v27 }
 0x17f   : > { %v790_v42 = vmin.f32 %v760_v10, 6.0  ;;  %1039 = vst [vmem:[#allocation2 + $0xe8] sm:$0xff] %v1009_v36  ;;  %v1238_v47 = vadd.f32 %v1222_v63, %v1185_v14  ;;  %v1274_v56 = vmul.f32 %v1409_v34, %v3004_v49  ;;  %v605_v48 = vpop.f32.mrf.mxu0  ;;  %v1445_v32 = vadd.f32 %v1429_v35, %v1393_v55  ;;  %v3323_v55 = vld [vmem:[%s3803_s5] ss:$0 sm:$0xff] }
 0x180   : > { %v1239_v52 = vadd.f32 %v1223_v37, %v1186_v59  ;;  %v1326_v54 = vmul.f32 %v3299_v24, %v3019_v58  ;;  %v1379_v50 = vmul.f32 %v2988_v41, %v3296_v26  ;;  %v761_v28 = vmax.f32 %v731_v44, 0.0  ;;  %v1410_v45 = vld [vmem:[#allocation2 + $0x39] sm:$0xff] }
 0x181   : > { %v3317_v60 = vsel %vm3257_vm12, 0.0, %v790_v42  ;;  %v695_v61 = vmul.f32 %v2927_v1, %v605_v48  ;;  %v1462_v53 = vld [vmem:[#allocation2 + $0x3a] sm:$0xff]  ;;  %v1290_v62 = vadd.f32 %v1274_v56, %v1238_v47  ;;  %v2116_v57 = vpop.f32.mrf.mxu0  ;;  %v1430_v7 = vmul.f32 %v3035_v11, %v1410_v45 }
 0x182   : > { %1020 = vst [vmem:[#allocation2 + $0x50] sm:$0xff] %v3317_v60  ;;  %v1482_v8 = vmul.f32 %v3037_v12, %v1462_v53  ;;  %v1497_v21 = vadd.f32 %v1481_v0, %v1445_v32  ;;  %v1275_v9 = vmul.f32 %v1410_v45, %v3004_v49  ;;  %v791_v25 = vmin.f32 %v761_v28, 6.0 }
 0x183   : > { %v732_v14 = vadd.f32 %v2936_v4, %v695_v61  ;;  %v1327_v63 = vmul.f32 %v1462_v53, %v3019_v58  ;;  %v1342_v10 = vadd.f32 %v1326_v54, %v1290_v62  ;;  %v608_v27 = vpop.f32.mrf.mxu0  ;;  %vm829_vm3 = vcmp.eq.s32.totalorder %v3091_v51, 0 }
 0x184   : > { %vm839_vm4 = vcmp.ge.s32.totalorder %v3091_v51, 17  ;;  %v1446_v59 = vadd.f32 %v1430_v7, %v1394_v16  ;;  %v1520_v20 = vadd.f32 %v3323_v55, %v1497_v21  ;;  %v1291_v35 = vadd.f32 %v1275_v9, %v1239_v52 }
 0x185   : > { %v1380_v0 = vmul.f32 %v2988_v41, %v3317_v60  ;;  %v991_v46 = vsel %vm3330_vm1, 0.0, %v791_v25  ;;  %v762_v36 = vmax.f32 %v732_v14, 0.0  ;;  %v696_v37 = vmul.f32 %v2927_v1, %v608_v27  ;;  %v2117_v16 = vpop.f32.mrf.mxu0  ;;  %vm3414_vm10 = vmor %vm829_vm3, %vm839_vm4 }
 0x186   : > { %v1395_v42 = vadd.f32 %v1379_v50, %v1342_v10  ;;  %1021 = vst [vmem:[#allocation2 + $0x58] sm:$0xff] %v991_v46  ;;  %v1498_v44 = vadd.f32 %v1482_v8, %v1446_v59  ;;  %v1536_v47 = vmax.f32 %v1520_v20, 0.0  ;;  %v1343_v56 = vadd.f32 %v1327_v63, %v1291_v35  ;;  %vm872_vm11 = vmor %vm3414_vm10, %vm854_vm6 }
 0x187   : > { %v1067_v48 = vmul.f32 %v2969_v29, %v3210_v13  ;;  %v792_v32 = vmin.f32 %v762_v36, 6.0  ;;  %v733_v52 = vadd.f32 %v2936_v4, %v696_v37  ;;  %v1068_v54 = vmul.f32 %v2969_v29, %v3235_v3  ;;  %v613_v28 = vpop.f32.mrf.mxu0  ;;  %vm3473_vm12 = vmor %vm3414_vm10, %vm889_vm8 }
 0x188   : > { %v1119_v50 = vmul.f32 %v1409_v34, %v2982_v38  ;;  %v1521_v61 = vadd.f32 %v3323_v55, %v1498_v44  ;;  %v1552_v62 = vmin.f32 %v1536_v47, 6.0  ;;  %v1396_v6 = vadd.f32 %v1380_v0, %v1343_v56  ;;  %vm875_vm8 = vmor %vm2953_vm7, %vm854_vm6 }
 0x189   : > { %v1120_v57 = vmul.f32 %v1410_v45, %v2982_v38  ;;  %v3367_v7 = vsel %vm869_vm5, 0.0, %v792_v32  ;;  %v763_v8 = vmax.f32 %v733_v52, 0.0  ;;  %v697_v13 = vmul.f32 %v2927_v1, %v613_v28  ;;  %v3370_v21 = vld [vmem:[#allocation2 + $0x49] sm:$0xff]  ;;  %v2120_v3 = vpop.f32.mrf.mxu0 }
 0x18a   : > { %v3372_v9 = vld [vmem:[#allocation2 + $0x4a] sm:$0xff]  ;;  %v1135_v25 = vadd.f32 %v1119_v50, %v1067_v48  ;;  %1022 = vst [vmem:[#allocation2 + $0x60] sm:$0xff] %v3367_v7  ;;  %v1537_v34 = vmax.f32 %v1521_v61, 0.0  ;;  %v1431_v14 = vmul.f32 %v3035_v11, %v3370_v21  ;;  %v1171_v59 = vmul.f32 %v3299_v24, %v2984_v39 }
 0x18b   : > { %v1483_v45 = vmul.f32 %v3037_v12, %v3372_v9  ;;  %v1136_v63 = vadd.f32 %v1120_v57, %v1068_v54  ;;  %v793_v10 = vmin.f32 %v763_v8, 6.0  ;;  %v734_v27 = vadd.f32 %v2936_v4, %v697_v13  ;;  %v616_v35 = vpop.f32.mrf.mxu0 }
 0x18c   : > { %v1172_v20 = vmul.f32 %v1462_v53, %v2984_v39  ;;  %v1553_v0 = vmin.f32 %v1537_v34, 6.0  ;;  %v1447_v46 = vadd.f32 %v1431_v14, %v1395_v42  ;;  %v1224_v36 = vmul.f32 %v2986_v40, %v3296_v26 }
 0x18d   : > { %v1225_v37 = vmul.f32 %v2986_v40, %v3317_v60  ;;  %v3389_v16 = vsel %vm3342_vm2, 0.0, %v793_v10  ;;  %v764_v44 = vmax.f32 %v734_v27, 0.0  ;;  %v698_v47 = vmul.f32 %v2927_v1, %v616_v35  ;;  %v3392_v56 = vld [vmem:[#allocation2 + $0x51] sm:$0xff]  ;;  %v2121_v48 = vpop.f32.mrf.mxu0 }
 0x18e   : > { %v3394_v24 = vld [vmem:[#allocation2 + $0x52] sm:$0xff]  ;;  %v1187_v53 = vadd.f32 %v1171_v59, %v1135_v25  ;;  %1023 = vst [vmem:[#allocation2 + $0x68] sm:$0xff] %v3389_v16  ;;  %v1568_v32 = vpack.c.bf16 %v1553_v0, %v1552_v62  ;;  %v1432_v52 = vmul.f32 %v3035_v11, %v3392_v56  ;;  %v1499_v50 = vadd.f32 %v1483_v45, %v1447_v46 }
 0x18f   : > { %v1484_v54 = vmul.f32 %v3037_v12, %v3394_v24  ;;  %v794_v28 = vmin.f32 %v764_v44, 6.0  ;;  %v735_v61 = vadd.f32 %v2936_v4, %v698_v47  ;;  %v1188_v57 = vadd.f32 %v1172_v20, %v1136_v63  ;;  %v621_v8 = vpop.f32.mrf.mxu0 }
 0x190   : > { %v1240_v62 = vadd.f32 %v1224_v36, %v1187_v53  ;;  %2166 = vmatprep.mubr.bf16.mxu1 %v1568_v32  ;;  %v1448_v13 = vadd.f32 %v1432_v52, %v1396_v6  ;;  %v1522_v25 = vadd.f32 %v3323_v55, %v1499_v50  ;;  %v1276_v3 = vmul.f32 %v3370_v21, %v3004_v49 }
 0x191   : > { %v1277_v34 = vmul.f32 %v3392_v56, %v3004_v49  ;;  %v994_v51 = vsel %vm3401_vm9, 0.0, %v794_v28  ;;  %v765_v14 = vmax.f32 %v735_v61, 0.0  ;;  %v699_v45 = vmul.f32 %v2927_v1, %v621_v8  ;;  %v2124_v6 = vpop.f32.mrf.mxu0 }
 0x192   : > { %v1241_v10 = vadd.f32 %v1225_v37, %v1188_v57  ;;  %1024 = vst [vmem:[#allocation2 + $0x70] sm:$0xff] %v994_v51  ;;  %v1500_v63 = vadd.f32 %v1484_v54, %v1448_v13  ;;  %v1538_v27 = vmax.f32 %v1522_v25, 0.0  ;;  %v1292_v59 = vadd.f32 %v1276_v3, %v1240_v62 }
 0x193   : > { %v1328_v20 = vmul.f32 %v3372_v9, %v3019_v58  ;;  %v795_v35 = vmin.f32 %v765_v14, 6.0  ;;  %v736_v0 = vadd.f32 %v2936_v4, %v699_v45  ;;  %v1329_v36 = vmul.f32 %v3394_v24, %v3019_v58  ;;  %v624_v37 = vpop.f32.mrf.mxu0 }
 0x194   : > { %v1293_v46 = vadd.f32 %v1277_v34, %v1241_v10  ;;  %v1523_v44 = vadd.f32 %v3323_v55, %v1500_v63  ;;  %v1554_v47 = vmin.f32 %v1538_v27, 6.0  ;;  %v1381_v42 = vmul.f32 %v2988_v41, %v3367_v7 }
 0x195   : > { %v1344_v53 = vadd.f32 %v1328_v20, %v1292_v59  ;;  %v3438_v48 = vsel %vm872_vm11, 0.0, %v795_v35  ;;  %v766_v32 = vmax.f32 %v736_v0, 0.0  ;;  %v700_v52 = vmul.f32 %v2927_v1, %v624_v37  ;;  %v3441_v50 = vld [vmem:[#allocation2 + $0x61] sm:$0xff]  ;;  %v2125_v61 = vpop.f32.mrf.mxu0 }
 0x196   : > { %v1345_v54 = vadd.f32 %v1329_v36, %v1293_v46  ;;  %v3443_v28 = vld [vmem:[#allocation2 + $0x62] sm:$0xff]  ;;  %1025 = vst [vmem:[#allocation2 + $0x78] sm:$0xff] %v3438_v48  ;;  %v1539_v57 = vmax.f32 %v1523_v44, 0.0  ;;  %v1382_v62 = vmul.f32 %v2988_v41, %v3389_v16  ;;  %v1433_v13 = vmul.f32 %v3035_v11, %v3441_v50 }
 0x197   : > { %v1397_v8 = vadd.f32 %v1381_v42, %v1344_v53  ;;  %v796_v25 = vmin.f32 %v766_v32, 6.0  ;;  %v737_v3 = vadd.f32 %v2936_v4, %v700_v52  ;;  %v1485_v34 = vmul.f32 %v3037_v12, %v3443_v28  ;;  %v629_v14 = vpop.f32.mrf.mxu0 }
 0x198   : > { %v1069_v51 = vmul.f32 %v2969_v29, %v3296_v26  ;;  %v1555_v45 = vmin.f32 %v1539_v57, 6.0  ;;  %v1398_v10 = vadd.f32 %v1382_v62, %v1345_v54  ;;  %v1070_v63 = vmul.f32 %v2969_v29, %v3317_v60 }
 0x199   : > { %v1449_v6 = vadd.f32 %v1433_v13, %v1397_v8  ;;  %v3459_v27 = vsel %vm3414_vm10, 0.0, %v796_v25  ;;  %v767_v59 = vmax.f32 %v737_v3, 0.0  ;;  %v701_v20 = vmul.f32 %v2927_v1, %v629_v14  ;;  %v3462_v35 = vld [vmem:[#allocation2 + $0x69] sm:$0xff]  ;;  %v2128_v46 = vpop.f32.mrf.mxu0 }
 0x19a   : > { %v3464_v0 = vld [vmem:[#allocation2 + $0x6a] sm:$0xff]  ;;  %v1121_v26 = vmul.f32 %v3370_v21, %v2982_v38  ;;  %1026 = vst [vmem:[#allocation2 + $0x80] sm:$0xff] %v3459_v27  ;;  %v1569_v36 = vpack.c.bf16 %v1555_v45, %v1554_v47  ;;  %v1434_v37 = vmul.f32 %v3035_v11, %v3462_v35  ;;  %v1122_v5 = vmul.f32 %v3392_v56, %v2982_v38 }
 0x19b   : > { %v1486_v44 = vmul.f32 %v3037_v12, %v3464_v0  ;;  %v1501_v53 = vadd.f32 %v1485_v34, %v1449_v6  ;;  %v797_v21 = vmin.f32 %v767_v59, 6.0  ;;  %v738_v42 = vadd.f32 %v2936_v4, %v701_v20  ;;  %v632_v32 = vpop.f32.mrf.mxu0 }
 0x19c   : > { %v1137_v33 = vadd.f32 %v1121_v26, %v1069_v51  ;;  %2167 = vmatmul.mubr.bf16.vlgmr.msra.gmra.mxu1 %v1569_v36  ;;  %v1450_v52 = vadd.f32 %v1434_v37, %v1398_v10  ;;  %v1173_v47 = vmul.f32 %v3372_v9, %v2984_v39  ;;  %v1174_v61 = vmul.f32 %v3394_v24, %v2984_v39 }
 0x19d   : > { %v1524_v54 = vadd.f32 %v3323_v55, %v1501_v53  ;;  %v997_v57 = vsel %vm3473_vm12, 0.0, %v797_v21  ;;  %v768_v62 = vmax.f32 %v738_v42, 0.0  ;;  %v702_v8 = vmul.f32 %v2927_v1, %v632_v32  ;;  %v2129_v56 = vpop.f32.mrf.mxu0 }
 0x19e   : > { %v1138_v13 = vadd.f32 %v1122_v5, %v1070_v63  ;;  %1027 = vst [vmem:[#allocation2 + $0x88] sm:$0xff] %v997_v57  ;;  %v1502_v25 = vadd.f32 %v1486_v44, %v1450_v52  ;;  %v1189_v9 = vadd.f32 %v1173_v47, %v1137_v33  ;;  %v1226_v24 = vmul.f32 %v2986_v40, %v3367_v7 }
 0x19f   : > { %v1540_v3 = vmax.f32 %v1524_v54, 0.0  ;;  %v798_v34 = vmin.f32 %v768_v62, 6.0  ;;  %v739_v51 = vadd.f32 %v2936_v4, %v702_v8  ;;  %v1227_v1 = vmul.f32 %v2986_v40, %v3389_v16 }
 0x1a0   : > { %v1190_v14 = vadd.f32 %v1174_v61, %v1138_v13  ;;  %v1525_v45 = vadd.f32 %v3323_v55, %v1502_v25  ;;  %v1242_v10 = vadd.f32 %v1226_v24, %v1189_v9  ;;  %v1278_v6 = vmul.f32 %v3441_v50, %v3004_v49 }
 0x1a1   : > { %v1556_v2 = vmin.f32 %v1540_v3, 6.0  ;;  %v3504_v63 = vsel %vm875_vm8, 0.0, %v798_v34  ;;  %v769_v59 = vmax.f32 %v739_v51, 0.0  ;;  %v1279_v26 = vmul.f32 %v3462_v35, %v3004_v49  ;;  %v1415_v60 = vld [vmem:[#allocation2 + $0x79] sm:$0xff] }
 0x1a2   : > { %v1243_v20 = vadd.f32 %v1227_v1, %v1190_v14  ;;  %v3508_v4 = vld [vmem:[#allocation2 + $0x7a] sm:$0xff]  ;;  %1028 = vst [vmem:[#allocation2 + $0x90] sm:$0xff] %v3504_v63  ;;  %v1541_v46 = vmax.f32 %v1525_v45, 0.0  ;;  %v1294_v36 = vadd.f32 %v1278_v6, %v1242_v10  ;;  %v1330_v37 = vmul.f32 %v3443_v28, %v3019_v58 }
 0x1a3   : > { %v1331_v44 = vmul.f32 %v3464_v0, %v3019_v58  ;;  %v799_v53 = vmin.f32 %v769_v59, 6.0  ;;  %v1383_v42 = vmul.f32 %v2988_v41, %v3438_v48  ;;  %v1384_v5 = vmul.f32 %v2988_v41, %v3459_v27 }
 0x1a4   : > { %v1295_v21 = vadd.f32 %v1279_v26, %v1243_v20  ;;  %v1557_v33 = vmin.f32 %v1541_v46, 6.0  ;;  %v1346_v32 = vadd.f32 %v1330_v37, %v1294_v36  ;;  %v1435_v52 = vmul.f32 %v3035_v11, %v1415_v60 }
 0x1a5   : > { %v1487_v54 = vmul.f32 %v3037_v12, %v3508_v4  ;;  %v3524_v47 = vsel %vm2953_vm7, 0.0, %v799_v53  ;;  %v1416_v57 = vld [vmem:[#allocation2 + $0x81] sm:$0xff]  ;;  %v1071_v8 = vmul.f32 %v2969_v29, %v3367_v7  ;;  %v1072_v13 = vmul.f32 %v2969_v29, %v3389_v16 }
 0x1a6   : > { %v1347_v61 = vadd.f32 %v1331_v44, %v1295_v21  ;;  %v1468_v62 = vld [vmem:[#allocation2 + $0x82] sm:$0xff]  ;;  %1029 = vst [vmem:[#allocation2 + $0x98] sm:$0xff] %v3524_v47  ;;  %v1570_v56 = vpack.c.bf16 %v1557_v33, %v1556_v2  ;;  %v1399_v25 = vadd.f32 %v1383_v42, %v1346_v32  ;;  %v1436_v3 = vmul.f32 %v3035_v11, %v1416_v57 }
 0x1a7   : > { %v1488_v9 = vmul.f32 %v3037_v12, %v1468_v62  ;;  %v1123_v24 = vmul.f32 %v3441_v50, %v2982_v38  ;;  %v1124_v34 = vmul.f32 %v3462_v35, %v2982_v38  ;;  %v1175_v7 = vmul.f32 %v3443_v28, %v2984_v39 }
 0x1a8   : > { %v1400_v18 = vadd.f32 %v1384_v5, %v1347_v61  ;;  %2170 = vmatprep.mubr.bf16.mxu1 %v1570_v56  ;;  %v1451_v16 = vadd.f32 %v1435_v52, %v1399_v25  ;;  %v1176_v51 = vmul.f32 %v3464_v0, %v2984_v39  ;;  %v1228_v14 = vmul.f32 %v2986_v40, %v3438_v48 }
 0x1a9   : > { %v1229_v1 = vmul.f32 %v2986_v40, %v3459_v27  ;;  %v1139_v2 = vadd.f32 %v1123_v24, %v1071_v8  ;;  %v1140_v50 = vadd.f32 %v1124_v34, %v1072_v13  ;;  %v1280_v10 = vmul.f32 %v1415_v60, %v3004_v49 }
 0x1aa   : > { %v1452_v45 = vadd.f32 %v1436_v3, %v1400_v18  ;;  %v1503_v35 = vadd.f32 %v1487_v54, %v1451_v16  ;;  %v1281_v6 = vmul.f32 %v1416_v57, %v3004_v49  ;;  %v1332_v28 = vmul.f32 %v3508_v4, %v3019_v58 }
 0x1ab   : > { %v1333_v59 = vmul.f32 %v1468_v62, %v3019_v58  ;;  %v1191_v20 = vadd.f32 %v1175_v7, %v1139_v2  ;;  %v1192_v26 = vadd.f32 %v1176_v51, %v1140_v50  ;;  %v1385_v46 = vmul.f32 %v2988_v41, %v3504_v63 }
 0x1ac   : > { %v1504_v0 = vadd.f32 %v1488_v9, %v1452_v45  ;;  %v1526_v36 = vadd.f32 %v3323_v55, %v1503_v35  ;;  %v1386_v37 = vmul.f32 %v2988_v41, %v3524_v47  ;;  %v1073_v44 = vmul.f32 %v2969_v29, %v3438_v48 }
 0x1ad   : > { %v1074_v53 = vmul.f32 %v2969_v29, %v3459_v27  ;;  %v1244_v42 = vadd.f32 %v1228_v14, %v1191_v20  ;;  %v1245_v5 = vadd.f32 %v1229_v1, %v1192_v26  ;;  %v1417_v33 = vld [vmem:[#allocation2 + $0x91] sm:$0xff]  ;;  %v1418_v32 = vld [vmem:[#allocation2 + $0x99] sm:$0xff]  ;;  %v1125_v54 = vmul.f32 %v1415_v60, %v2982_v38 }
 0x1ae   : > { %v1527_v21 = vadd.f32 %v3323_v55, %v1504_v0  ;;  %v1469_v52 = vld [vmem:[#allocation2 + $0x92] sm:$0xff]  ;;  %v1542_v61 = vmax.f32 %v1526_v36, 0.0  ;;  %v1437_v8 = vmul.f32 %v3035_v11, %v1417_v33  ;;  %v1438_v13 = vmul.f32 %v3035_v11, %v1418_v32  ;;  %v1470_v56 = vld [vmem:[#allocation2 + $0x9a] sm:$0xff] }
 0x1af   : > { %v1489_v48 = vmul.f32 %v3037_v12, %v1469_v52  ;;  %v1296_v3 = vadd.f32 %v1280_v10, %v1244_v42  ;;  %v1297_v27 = vadd.f32 %v1281_v6, %v1245_v5  ;;  %v1490_v9 = vmul.f32 %v3037_v12, %v1470_v56  ;;  %v3573_v10 = vld [vmem:[#allocation2 + $0xaa] sm:$0xff] }
 0x1b0   : > { %v1543_v25 = vmax.f32 %v1527_v21, 0.0  ;;  %v1558_v18 = vmin.f32 %v1542_v61, 6.0  ;;  %v1126_v24 = vmul.f32 %v1416_v57, %v2982_v38  ;;  %v1141_v34 = vadd.f32 %v1125_v54, %v1073_v44  ;;  %v3579_v44 = vld [vmem:[#allocation2 + $0xb2] sm:$0xff] }
 0x1b1   : > { %v1177_v60 = vmul.f32 %v3508_v4, %v2984_v39  ;;  %v1348_v16 = vadd.f32 %v1332_v28, %v1296_v3  ;;  %v1349_v51 = vadd.f32 %v1333_v59, %v1297_v27  ;;  %v1178_v14 = vmul.f32 %v1468_v62, %v2984_v39 }
 0x1b2   : > { %v1559_v7 = vmin.f32 %v1543_v25, 6.0  ;;  %v1142_v1 = vadd.f32 %v1126_v24, %v1074_v53  ;;  %v1230_v2 = vmul.f32 %v2986_v40, %v3504_v63  ;;  %v1231_v50 = vmul.f32 %v2986_v40, %v3524_v47 }
 0x1b3   : > { %v1193_v45 = vadd.f32 %v1177_v60, %v1141_v34  ;;  %v1401_v35 = vadd.f32 %v1385_v46, %v1348_v16  ;;  %v1402_v6 = vadd.f32 %v1386_v37, %v1349_v51  ;;  %v1282_v4 = vmul.f32 %v1417_v33, %v3004_v49 }
 0x1b4   : > { %v1571_v57 = vpack.c.bf16 %v1559_v7, %v1558_v18  ;;  %v1194_v0 = vadd.f32 %v1178_v14, %v1142_v1  ;;  %v1283_v59 = vmul.f32 %v1418_v32, %v3004_v49  ;;  %v1334_v62 = vmul.f32 %v1469_v52, %v3019_v58 }
 0x1b5   : > { %v1246_v28 = vadd.f32 %v1230_v2, %v1193_v45  ;;  %v1453_v20 = vadd.f32 %v1437_v8, %v1401_v35  ;;  %v1454_v26 = vadd.f32 %v1438_v13, %v1402_v6  ;;  %v1335_v36 = vmul.f32 %v1470_v56, %v3019_v58 }
 0x1b6   : > { %2171 = vmatmul.mubr.bf16.gmra.mxu1 %v1571_v57  ;;  %v1491_v53 = vmul.f32 %v3037_v12, %v3573_v10  ;;  %v1247_v46 = vadd.f32 %v1231_v50, %v1194_v0  ;;  %v1492_v21 = vmul.f32 %v3037_v12, %v3579_v44  ;;  %v1075_v42 = vmul.f32 %v2969_v29, %v3504_v63 }
 0x1b7   : > { %v1298_v37 = vadd.f32 %v1282_v4, %v1246_v28  ;;  %v1505_v5 = vadd.f32 %v1489_v48, %v1453_v20  ;;  %v1506_v54 = vadd.f32 %v1490_v9, %v1454_v26  ;;  %v1076_v61 = vmul.f32 %v2969_v29, %v3524_v47  ;;  %v1370_v28 = vld [vmem:[#allocation2 + $0xc8] sm:$0xff] }
 0x1b8   : > { %v1127_v8 = vmul.f32 %v1417_v33, %v2982_v38  ;;  %v1299_v13 = vadd.f32 %v1283_v59, %v1247_v46  ;;  %v1128_v3 = vmul.f32 %v1418_v32, %v2982_v38  ;;  %v1179_v27 = vmul.f32 %v1469_v52, %v2984_v39  ;;  %v1473_v46 = vld [vmem:[#allocation2 + $0xc2] sm:$0xff] }
 0x1b9   : > { %v1350_v25 = vadd.f32 %v1334_v62, %v1298_v37  ;;  %v1528_v18 = vadd.f32 %v3323_v55, %v1505_v5  ;;  %v1529_v24 = vadd.f32 %v3323_v55, %v1506_v54  ;;  %v1180_v63 = vmul.f32 %v1470_v56, %v2984_v39  ;;  %v1474_v54 = vld [vmem:[#allocation2 + $0xca] sm:$0xff] }
 0x1ba   : > { %v1143_v34 = vadd.f32 %v1127_v8, %v1075_v42  ;;  %v1351_v48 = vadd.f32 %v1335_v36, %v1299_v13  ;;  %v1144_v60 = vadd.f32 %v1128_v3, %v1076_v61  ;;  %v1232_v47 = vmul.f32 %v3119_v15, %v2986_v40  ;;  %v1421_v36 = vld [vmem:[#allocation2 + $0xc1] sm:$0xff] }
 0x1bb   : > { %v1403_v9 = vadd.f32 %v3124_v22, %v1350_v25  ;;  %v1544_v33 = vmax.f32 %v1528_v18, 0.0  ;;  %v1545_v7 = vmax.f32 %v1529_v24, 0.0  ;;  %v1233_v32 = vmul.f32 %v3180_v17, %v2986_v40 }
 0x1bc   : > { %v1195_v16 = vadd.f32 %v1179_v27, %v1143_v34  ;;  %v1404_v52 = vadd.f32 %v3185_v19, %v1351_v48  ;;  %v1196_v14 = vadd.f32 %v1180_v63, %v1144_v60  ;;  %v1284_v56 = vmul.f32 %v3187_v43, %v3004_v49  ;;  %v1369_v19 = vld [vmem:[#allocation2 + $0xc0] sm:$0xff] }
 0x1bd   : > { %v1455_v51 = vadd.f32 %v3202_v30, %v1403_v9  ;;  %v1560_v1 = vmin.f32 %v1544_v33, 6.0  ;;  %v1561_v22 = vmin.f32 %v1545_v7, 6.0  ;;  %v1285_v2 = vmul.f32 %v3189_v23, %v3004_v49 }
 0x1be   : > { %v1248_v45 = vadd.f32 %v1232_v47, %v1195_v16  ;;  %v1456_v50 = vadd.f32 %v3206_v31, %v1404_v52  ;;  %v1249_v35 = vadd.f32 %v1233_v32, %v1196_v14  ;;  %v1336_v6 = vmul.f32 %v3573_v10, %v3019_v58 }
 0x1bf   : > { %v1507_v57 = vadd.f32 %v1491_v53, %v1455_v51  ;;  %v1572_v4 = vpack.c.bf16 %v1561_v22, %v1560_v1  ;;  %v1337_v0 = vmul.f32 %v3579_v44, %v3019_v58  ;;  %v1389_v59 = vmul.f32 %v2988_v41, %v1369_v19  ;;  %v1422_v53 = vld [vmem:[#allocation2 + $0xc9] sm:$0xff]  ;;  %v1372_v22 = vld [vmem:[#allocation2 + $0xe0] sm:$0xff] }
 0x1c0   : > { %v1300_v30 = vadd.f32 %v1284_v56, %v1248_v45  ;;  %v1508_v62 = vadd.f32 %v1492_v21, %v1456_v50  ;;  %v1301_v26 = vadd.f32 %v1285_v2, %v1249_v35  ;;  %v1390_v31 = vmul.f32 %v2988_v41, %v1370_v28  ;;  %v1423_v50 = vld [vmem:[#allocation2 + $0xd9] sm:$0xff] }
 0x1c1   : > { %v1530_v20 = vadd.f32 %v3323_v55, %v1507_v57  ;;  %2174 = vmatprep.mubr.bf16.mxu1 %v1572_v4  ;;  %v1441_v42 = vmul.f32 %v3035_v11, %v1421_v36  ;;  %v1442_v5 = vmul.f32 %v3035_v11, %v1422_v53  ;;  %v1493_v61 = vmul.f32 %v3037_v12, %v1473_v46 }
 0x1c2   : > { %v1352_v37 = vadd.f32 %v1336_v6, %v1300_v30  ;;  %v1531_v8 = vadd.f32 %v3323_v55, %v1508_v62  ;;  %v1353_v13 = vadd.f32 %v1337_v0, %v1301_v26  ;;  %v1494_v25 = vmul.f32 %v3037_v12, %v1474_v54  ;;  %v1475_v0 = vld [vmem:[#allocation2 + $0xda] sm:$0xff] }
 0x1c3   : > { %v1546_v21 = vmax.f32 %v1530_v20, 0.0  ;;  %v1077_v27 = vmul.f32 %v3119_v15, %v2969_v29  ;;  %v1078_v18 = vmul.f32 %v3180_v17, %v2969_v29  ;;  %v1129_v24 = vmul.f32 %v3187_v43, %v2982_v38  ;;  %v1476_v20 = vld [vmem:[#allocation2 + $0xe2] sm:$0xff] }
 0x1c4   : > { %v1405_v3 = vadd.f32 %v1389_v59, %v1352_v37  ;;  %v1547_v34 = vmax.f32 %v1531_v8, 0.0  ;;  %v1406_v48 = vadd.f32 %v1390_v31, %v1353_v13  ;;  %v1130_v9 = vmul.f32 %v3189_v23, %v2982_v38 }
 0x1c5   : > { %v1562_v63 = vmin.f32 %v1546_v21, 6.0  ;;  %v1145_v47 = vadd.f32 %v1129_v24, %v1077_v27  ;;  %v1181_v33 = vmul.f32 %v3573_v10, %v2984_v39  ;;  %v1182_v15 = vmul.f32 %v3579_v44, %v2984_v39  ;;  %v1371_v10 = vld [vmem:[#allocation2 + $0xd8] sm:$0xff]  ;;  %v3656_v24 = vld [vmem:[%s3902_s20] ss:$0 sm:$0xff]  ;;  %s2470_s20 = scalar_lea.vmem %s2469_s28, 4096 }
 0x1c6   : > { %v1457_v60 = vadd.f32 %v1441_v42, %v1405_v3  ;;  %v1563_v7 = vmin.f32 %v1547_v34, 6.0  ;;  %v1458_v16 = vadd.f32 %v1442_v5, %v1406_v48  ;;  %v1146_v29 = vadd.f32 %v1130_v9, %v1078_v18  ;;  %v2013_v34 = vld [vmem:[%s2858_s17 + $0x31] sm:$0xff] }
 0x1c7   : > { %v1234_v17 = vmul.f32 %v1369_v19, %v2986_v40  ;;  %v1197_v32 = vadd.f32 %v1181_v33, %v1145_v47  ;;  %v1235_v52 = vmul.f32 %v1370_v28, %v2986_v40  ;;  %v1286_v51 = vmul.f32 %v1421_v36, %v3004_v49  ;;  %v1424_v19 = vld [vmem:[#allocation2 + $0xe1] sm:$0xff] }
 0x1c8   : > { %v1509_v43 = vadd.f32 %v1493_v61, %v1457_v60  ;;  %v1573_v38 = vpack.c.bf16 %v1563_v7, %v1562_v63  ;;  %v1510_v23 = vadd.f32 %v1494_v25, %v1458_v16  ;;  %v1198_v14 = vadd.f32 %v1182_v15, %v1146_v29  ;;  %v2011_v60 = vld [vmem:[%s2858_s17 + $0x19] sm:$0xff] }
 0x1c9   : > { %v1287_v56 = vmul.f32 %v1422_v53, %v3004_v49  ;;  %v1250_v39 = vadd.f32 %v1234_v17, %v1197_v32  ;;  %v1338_v44 = vmul.f32 %v1473_v46, %v3019_v58  ;;  %v1339_v40 = vmul.f32 %v1474_v54, %v3019_v58  ;;  %v2014_v16 = vld [vmem:[%s2858_s17 + $0x39] sm:$0xff] }
 0x1ca   : > { %v1532_v1 = vadd.f32 %v3323_v55, %v1509_v43  ;;  %2175 = vmatmul.mubr.bf16.gmra.mxu1 %v1573_v38  ;;  %v1533_v45 = vadd.f32 %v3323_v55, %v1510_v23  ;;  %v1251_v2 = vadd.f32 %v1235_v52, %v1198_v14  ;;  %v1391_v6 = vmul.f32 %v2988_v41, %v1371_v10  ;;  %v2012_v52 = vld [vmem:[%s2858_s17 + $0x21] sm:$0xff] }
 0x1cb   : > { %v1302_v35 = vadd.f32 %v1286_v51, %v1250_v39  ;;  %v1392_v30 = vmul.f32 %v2988_v41, %v1372_v22  ;;  %v1443_v62 = vmul.f32 %v3035_v11, %v1423_v50  ;;  %v1444_v58 = vmul.f32 %v3035_v11, %v1424_v19  ;;  %v2017_v10 = vld [vmem:[%s2858_s17 + $0x61] sm:$0xff]  ;;  %v2015_v22 = vld [vmem:[%s2858_s17 + $0x49] sm:$0xff] }
 0x1cc   : > { %v1548_v57 = vmax.f32 %v1532_v1, 0.0  ;;  %v1549_v49 = vmax.f32 %v1533_v45, 0.0  ;;  %v1303_v4 = vadd.f32 %v1287_v56, %v1251_v2  ;;  %v1495_v53 = vmul.f32 %v3037_v12, %v1475_v0 }
 0x1cd   : > { %v1354_v59 = vadd.f32 %v1338_v44, %v1302_v35  ;;  %v1496_v42 = vmul.f32 %v3037_v12, %v1476_v20  ;;  %v3651_v12 = vld [vmem:[%s3901_s8] ss:$0 sm:$0xff]  ;;  %v2021_v20 = vld [vmem:[%s2858_s17 + $0x91] sm:$0xff]  ;;  %s3738_s8 = scalar_lea.sflag [#allocation5], %s406_s1 }
 0x1ce   : > { %v1564_v28 = vmin.f32 %v1548_v57, 6.0  ;;  %v1565_v26 = vmin.f32 %v1549_v49, 6.0  ;;  %v1355_v31 = vadd.f32 %v1339_v40, %v1303_v4  ;;  %v2018_v57 = vld [vmem:[%s2858_s17 + $0x69] sm:$0xff]  ;;  %v2016_v4 = vld [vmem:[%s2858_s17 + $0x51] sm:$0xff] }
 0x1cf   : > { %v1407_v36 = vadd.f32 %v1391_v6, %v1354_v59 }
 0x1d0   : > { %v1574_v46 = vpack.c.bf16 %v1565_v26, %v1564_v28  ;;  %v1408_v37 = vadd.f32 %v1392_v30, %v1355_v31 }
 0x1d1   : > { %v1459_v5 = vadd.f32 %v1443_v62, %v1407_v36  ;;  %v2019_v36 = vld [vmem:[%s2858_s17 + $0x79] sm:$0xff] }
 0x1d2   : > { %2178 = vmatprep.mubr.bf16.mxu1 %v1574_v46  ;;  %v1460_v41 = vadd.f32 %v1444_v58, %v1408_v37 }
 0x1d3   : > { %v1511_v54 = vadd.f32 %v1495_v53, %v1459_v5  ;;  %v2022_v5 = vld [vmem:[%s2858_s17 + $0x99] sm:$0xff] }
 0x1d4   : > { %v1512_v61 = vadd.f32 %v1496_v42, %v1460_v41 }
 0x1d5   : > { %v1534_v8 = vadd.f32 %v3323_v55, %v1511_v54 }
 0x1d6   : > { %v1535_v21 = vadd.f32 %v3323_v55, %v1512_v61 }
 0x1d7   : > { %v1550_v11 = vmax.f32 %v1534_v8, 0.0 }
 0x1d8   : > { %v1551_v13 = vmax.f32 %v1535_v21, 0.0  ;;  %v2020_v21 = vld [vmem:[%s2858_s17 + $0x81] sm:$0xff] }
 0x1d9   : > { %v1566_v25 = vmin.f32 %v1550_v11, 6.0 }
 0x1da   : > { %v1567_v3 = vmin.f32 %v1551_v13, 6.0 }
 0x1dc   : > { %v1575_v27 = vpack.c.bf16 %v1567_v3, %v1566_v25 }
 0x1de   : > { %2179 = vmatmul.mubr.bf16.gmra.mxu1 %v1575_v27 }
 0x25c   : > { %v2168_v18 = vpop.f32.mrf.mxu1 }
 0x25d   : > { %v1746_v55 = vmul.f32 %v2168_v18, %v3651_v12  ;;  %v2025_v18 = vld [vmem:[%s2858_s17 + $0xc1] sm:$0xff] }
 0x25e   : > { %v1674_v63 = vpop.f32.mrf.mxu1 }
 0x25f   : > { %v1769_v48 = vadd.f32 %v3656_v24, %v1746_v55  ;;  %v1744_v9 = vmul.f32 %v3651_v12, %v1674_v63 }
 0x260   : > { %v2169_v47 = vpop.f32.mrf.mxu1 }
 0x261   : > { %v1804_v33 = vadd.f32 %v2013_v34, %v1769_v48  ;;  %v1767_v15 = vadd.f32 %v3656_v24, %v1744_v9  ;;  %v1747_v7 = vmul.f32 %v2169_v47, %v3651_v12  ;;  %v2023_v48 = vld [vmem:[%s2858_s17 + $0xa9] sm:$0xff] }
 0x262   : > { %v1677_v29 = vpop.f32.mrf.mxu1 }
 0x263   : > { %1820 = vst [vmem:[%s3668_s9 + $0x10] sm:$0xff] %v1804_v33  ;;  %v1802_v17 = vadd.f32 %v2011_v60, %v1767_v15  ;;  %v1770_v43 = vadd.f32 %v3656_v24, %v1747_v7  ;;  %v1745_v32 = vmul.f32 %v3651_v12, %v1677_v29  ;;  %v2026_v15 = vld [vmem:[%s2858_s17 + $0xc9] sm:$0xff] }
 0x265   : > { %1818 = vst [vmem:[%s3668_s9] sm:$0xff] %v1802_v17  ;;  %v1805_v51 = vadd.f32 %v2014_v16, %v1770_v43  ;;  %v1768_v38 = vadd.f32 %v3656_v24, %v1745_v32  ;;  %v2024_v43 = vld [vmem:[%s2858_s17 + $0xb1] sm:$0xff]  ;;  %s2464_s17 = scalar_lea.vmem %s3732_s25, 2048 }
 0x266   : > { %p2465_p11 = scmp.ne.s32.totalorder %s3732_s25, %s2464_s17  ;;  %p2472_p12 = scmp.lt.s32.totalorder %s2470_s20, %s2464_s17 }
 0x267   : > { %1821 = vst [vmem:[%s3668_s9 + $0x18] sm:$0xff] %v1805_v51  ;;  %v1803_v23 = vadd.f32 %v2012_v52, %v1768_v38 }
 0x268   : > { %p2466_p8 = pnand %p2465_p11, %p3906_p5  ;;  %p2473_p2 = por %p2472_p12, %p2471_p9 }
 0x269   : > { %1819 = vst [vmem:[%s3668_s9 + $0x8] sm:$0xff] %v1803_v23 }
 0x26a   : > { %p2467_p10 = pneg %p2466_p8 }
 0x26c   : > { %p2474_p1 = pnand %p2473_p2, %p2467_p10 }
 0x276   : > { %v2172_v14 = vpop.f32.mrf.mxu1 }
 0x277   : > { %v1750_v56 = vmul.f32 %v2172_v14, %v3651_v12 }
 0x278   : > { %v1690_v1 = vpop.f32.mrf.mxu1 }
 0x279   : > { %v1773_v39 = vadd.f32 %v3656_v24, %v1750_v56  ;;  %v1748_v44 = vmul.f32 %v3651_v12, %v1690_v1 }
 0x27a   : > { %v2173_v45 = vpop.f32.mrf.mxu1 }
 0x27b   : > { %v1808_v2 = vadd.f32 %v2017_v10, %v1773_v39  ;;  %v1771_v40 = vadd.f32 %v3656_v24, %v1748_v44  ;;  %v1751_v50 = vmul.f32 %v2173_v45, %v3651_v12 }
 0x27c   : > { %v1693_v35 = vpop.f32.mrf.mxu1 }
 0x27d   : > { %1824 = vst [vmem:[%s3668_s9 + $0x30] sm:$0xff] %v1808_v2  ;;  %v1806_v6 = vadd.f32 %v2015_v22, %v1771_v40  ;;  %v1774_v19 = vadd.f32 %v3656_v24, %v1751_v50  ;;  %v1749_v49 = vmul.f32 %v3651_v12, %v1693_v35 }
 0x27f   : > { %1822 = vst [vmem:[%s3668_s9 + $0x20] sm:$0xff] %v1806_v6  ;;  %v1809_v30 = vadd.f32 %v2018_v57, %v1774_v19  ;;  %v1772_v0 = vadd.f32 %v3656_v24, %v1749_v49 }
 0x281   : > { %1825 = vst [vmem:[%s3668_s9 + $0x38] sm:$0xff] %v1809_v30  ;;  %v1807_v28 = vadd.f32 %v2016_v4, %v1772_v0 }
 0x283   : > { %1823 = vst [vmem:[%s3668_s9 + $0x28] sm:$0xff] %v1807_v28 }
 0x28a   : > { %v2176_v59 = vpop.f32.mrf.mxu1 }
 0x28b   : > { %v1754_v62 = vmul.f32 %v2176_v59, %v3651_v12 }
 0x28c   : > { %v1706_v26 = vpop.f32.mrf.mxu1 }
 0x28d   : > { %v1777_v31 = vadd.f32 %v3656_v24, %v1754_v62  ;;  %v1752_v58 = vmul.f32 %v3651_v12, %v1706_v26 }
 0x28e   : > { %v2177_v53 = vpop.f32.mrf.mxu1 }
 0x28f   : > { %v1812_v46 = vadd.f32 %v2021_v20, %v1777_v31  ;;  %v1775_v37 = vadd.f32 %v3656_v24, %v1752_v58  ;;  %v1755_v42 = vmul.f32 %v2177_v53, %v3651_v12 }
 0x290   : > { %v1709_v41 = vpop.f32.mrf.mxu1 }
 0x291   : > { %1828 = vst [vmem:[%s3668_s9 + $0x50] sm:$0xff] %v1812_v46  ;;  %v1810_v54 = vadd.f32 %v2019_v36, %v1775_v37  ;;  %v1778_v61 = vadd.f32 %v3656_v24, %v1755_v42  ;;  %v1753_v8 = vmul.f32 %v3651_v12, %v1709_v41 }
 0x293   : > { %1826 = vst [vmem:[%s3668_s9 + $0x40] sm:$0xff] %v1810_v54  ;;  %v1813_v11 = vadd.f32 %v2022_v5, %v1778_v61  ;;  %v1776_v13 = vadd.f32 %v3656_v24, %v1753_v8 }
 0x295   : > { %1829 = vst [vmem:[%s3668_s9 + $0x58] sm:$0xff] %v1813_v11  ;;  %v1811_v25 = vadd.f32 %v2020_v21, %v1776_v13 }
 0x297   : > { %1827 = vst [vmem:[%s3668_s9 + $0x48] sm:$0xff] %v1811_v25 }
 0x29e   : > { %v2180_v3 = vpop.f32.mrf.mxu1 }
 0x29f   : > { %v1758_v27 = vmul.f32 %v2180_v3, %v3651_v12 }
 0x2a0   : > { %v1722_v55 = vpop.f32.mrf.mxu1 }
 0x2a1   : > { %v1781_v34 = vadd.f32 %v3656_v24, %v1758_v27  ;;  %v1756_v63 = vmul.f32 %v3651_v12, %v1722_v55 }
 0x2a2   : > { %v2181_v9 = vpop.f32.mrf.mxu1 }
 0x2a3   : > { %v1816_v60 = vadd.f32 %v2025_v18, %v1781_v34  ;;  %v1779_v47 = vadd.f32 %v3656_v24, %v1756_v63  ;;  %v1759_v33 = vmul.f32 %v2181_v9, %v3651_v12 }
 0x2a4   : > { %v1725_v7 = vpop.f32.mrf.mxu1 }
 0x2a5   : > { %1832 = vst [vmem:[%s3668_s9 + $0x70] sm:$0xff] %v1816_v60  ;;  %v1814_v16 = vadd.f32 %v2023_v48, %v1779_v47  ;;  %v1782_v29 = vadd.f32 %v3656_v24, %v1759_v33  ;;  %v1757_v17 = vmul.f32 %v3651_v12, %v1725_v7 }
 0x2a7   : > { %1830 = vst [vmem:[%s3668_s9 + $0x60] sm:$0xff] %v1814_v16  ;;  %v1817_v32 = vadd.f32 %v2026_v15, %v1782_v29  ;;  %v1780_v52 = vadd.f32 %v3656_v24, %v1757_v17 }
 0x2a9   : > { %1833 = vst [vmem:[%s3668_s9 + $0x78] sm:$0xff] %v1817_v32  ;;  %v1815_v51 = vadd.f32 %v2024_v43, %v1780_v52 }
 0x2ab   : > { %1831 = vst [vmem:[%s3668_s9 + $0x68] sm:$0xff] %v1815_v51 }
 0x2ac   : > { %2477 = shalt.err (!%p2474_p1)
}
 0x2ad   : > { %s2478_s1 = scalar_lea.hbm %s3730_s16, 2048  ;;  %s2482_s7 = scalar_lea.hbm %s3905_s6, 8192 }
 0x2ae   : > { %p2479_p3 = scmp.ne.s32.totalorder %s3730_s16, %s2478_s1  ;;  %p2483_p4 = scmp.lt.s32.totalorder %s3730_s16, %s3905_s6 }
 0x2af   : > { %p2484_p6 = scmp.lt.s32.totalorder %s2482_s7, %s2478_s1 }
 0x2b0   : > { %p2480_p7 = pnand %p2479_p3, %p3906_p5 }
 0x2b1   : > { %p2485_p13 = por %p2484_p6, %p2483_p4 }
 0x2b2   : > { %p2481_p0 = pneg %p2480_p7 }
 0x2b4   : > { %p2486_p11 = pnand %p2485_p13, %p2481_p0 }
 0x2b6   : > { %2489 = shalt.err (!%p2486_p11)
}
 0x2b7   : > { %s2605_s27 = smov 128   ;;  %s2606_s21 = smov 8  }
 0x2b8   : > { %2215 = dma.vmem_to_hbm [thread:$0]  (%p3906_p5), %s3732_s25, 2048, %s3730_s16, %s3738_s8, %s2605_s27, %s2605_s27, %s2606_s21  }
 0x2b9 PF: > { %s3907_s23 = sld [smem:[#allocation16_spill]]  ;;  %p2242_p8 = scmp.ge.s32.totalorder %s2592_s19, 2 }
 0x2ba   : > { %s3908_s12 = sld [smem:[#allocation20_spill]] }
 0x2bf   : > { %s1866_s17 = sand.u32 1, %s3907_s23  }
 0x2c0   : > { %p3909_p10 = scmp.ne.s32.totalorder %s3908_s12, 0  ;;  %s1867_s26 = scalar_lea.sflag [#allocation5], %s1866_s17 }
 0x2c2   : > { %p2232_p9 = pnand %p2242_p8, %p3909_p10 }
 0x2c4   : > { %p2233_p12 = pneg %p2232_p9 }
 0x2c6   : > { %2547 = dma.done.wait (%p2233_p12), %s1867_s26, 2048  }
 0x2c7   : > { %2549 = vsyncadd (%p2233_p12), %s1867_s26, 4294965248  ;;  %s27_s19 = sadd.s32 1, %s2592_s19   ;;  %s3910_s15 = sld [smem:[#allocation18_spill]] }
 0x2c8   : > { %p24_p2 = scmp.ge.s32.totalorder %s27_s19, 6   ;;  %s3911_s17 = sld [smem:[#allocation21_spill]] }
 0x2c9   : > { %s3912_s25 = sld [smem:[#allocation22_spill]]  ;;  %s3913_s30 = smov %s2556_s10 }
 0x2ca   : > { %s3914_s10 = smov %s2560_s11  ;;  %s3915_s11 = smov %s2804_s4 }
 0x2cb   : > { %s3916_s12 = smov %s2568_s13  ;;  %s3917_s13 = smov %s2572_s14 }
 0x2cc   : > { %s3918_s14 = smov %s2799_s29  ;;  %s3919_s16 = smov %s2588_s18 }
 0x2cd   :  { %26 = sbr.rel (!%p24_p2) target bundleno = 18 (0x12), region = 117 }
 0x2cf   : > { %s3920_s18 = smov %s3912_s25 }
 0x2d2   :  { %1872 = vsyncpa [#allocation4], 1 }
 0x2d3   :  { %1874 = vsyncpa [#allocation4 + $0x1], 1 }
 0x2d4   :  { %1875 = vsyncpa [#allocation7], 1 }
 0x2d5   :  { %1876 = vsyncpa [#allocation10], 1 }
 0x2d6   :  { %1877 = vsyncpa [#allocation5], 1 }
 0x2d7   :  { %1879 = vsyncpa [#allocation5 + $0x1], 1 }

</bundles_post_ra>
